<compile_context>
chip_gen: v7x
topology: tpu7x:2x2x1
jax: 0.10.0
libtpu: 0.0.40
codegen_flags: <defaults>
</compile_context>

<pallas_src>
import functools

import jax
import jax.numpy as jnp
from jax import lax
from jax.experimental import pallas as pl
from jax.experimental.pallas import tpu as pltpu

EPS = 1e-5
FEAT_PAD = 128   # lane-padded feature width (real emb_dim lives in lanes [0, D))
OUT_PAD = 128    # lane-padded readout width (real scalar lives in lane 0)


def _round_up(v, m):
    return ((v + m - 1) // m) * m


# ---------------------------------------------------------------------------
# Fused Pallas kernel: L x TSARLayer + global_mean_pool + MLP readout
# ---------------------------------------------------------------------------
def _tsarnet_kernel(src_ref, dst_ref, x0_ref, ef_ref, bc_ref, pool_ref,
                    wnode_ref, wat_ref, vec_ref, wro_ref, bro_ref,
                    o_ref, *, emb_dim, num_layers):
    e = src_ref.shape[0]          # padded edge count
    n = x0_ref.shape[0]           # padded node count
    dp = x0_ref.shape[1]          # padded feature width
    inv_d = 1.0 / float(emb_dim)

    # 0/1 gather / scatter operators built in-register from int32 indices
    # (only [E] index vectors cross HBM; no dense [E,N] matrices in memory).
    # Padded edges carry a sentinel index >= n -> all-zero rows/columns.
    # bf16 is exact for 0/1 values and hits the fast MXU path.
    gather_oh = (lax.broadcasted_iota(jnp.int32, (e, n), 1)
                 == src_ref[...]).astype(jnp.bfloat16)           # [E, N]
    scatter_oh = (lax.broadcasted_iota(jnp.int32, (n, e), 0)
                  == dst_ref[...]).astype(jnp.bfloat16)          # [N, E]

    # mask of real feature lanes (lanes >= emb_dim are zero padding)
    lane_mask = (lax.broadcasted_iota(jnp.int32, (1, dp), 1)
                 < emb_dim).astype(jnp.float32)

    ef = ef_ref[...]          # [E, ATp]  (constant across layers, VMEM-resident)
    bc = bc_ref[...]          # [N, Dp]
    x = x0_ref[...]           # [N, Dp]

    for l in range(num_layers):
        vec = vec_ref[l]                                          # [8, Dp]
        bm, bl_b, gam, bet = vec[0:1], vec[1:2], vec[2:3], vec[3:4]

        # (1) node-level transform first, (2) gather to edges second
        # (pure reorder, saves (E-N)*Dp^2 MACs vs. gather-then-matmul).
        xw = jnp.dot(x, wnode_ref[2 * l], preferred_element_type=jnp.float32)
        # bf16 truncation of xw / msg below is the documented numerics tradeoff
        # for the fast MXU path; accumulation stays f32.
        x_src_w = jnp.dot(gather_oh, xw.astype(jnp.bfloat16),
                          preferred_element_type=jnp.float32)     # [E, Dp]

        # msg_function(cat(x_src, edge_attr, edge_time_emb)) as split matmuls
        msg = jnp.maximum(
            x_src_w
            + jnp.dot(ef, wat_ref[l], preferred_element_type=jnp.float32)
            + bm, 0.0)

        # scatter-sum to destination nodes + boundary condition
        agg = jnp.dot(scatter_oh, msg.astype(jnp.bfloat16),
                      preferred_element_type=jnp.float32) + bc

        # node-wise linear
        out = jnp.dot(agg, wnode_ref[2 * l + 1],
                      preferred_element_type=jnp.float32) + bl_b

        # LayerNorm over the real emb_dim lanes (padded lanes are zero), eps=1e-5
        mean = jnp.sum(out, axis=-1, keepdims=True) * inv_d
        cen = (out - mean) * lane_mask
        var = jnp.sum(cen * cen, axis=-1, keepdims=True) * inv_d
        out = cen * lax.rsqrt(var + EPS) * gam + bet

        # ReLU; dropout(p=0.1) == identity in inference
        x = jnp.maximum(out, 0.0)

    # readout: global_mean_pool (pooling matmul) + MLP(Linear, ReLU, Linear)
    pooled = jnp.dot(pool_ref[...], x, preferred_element_type=jnp.float32)
    h = jnp.maximum(
        jnp.dot(pooled, wro_ref[0], preferred_element_type=jnp.float32)
        + bro_ref[0:1, :], 0.0)
    o_ref[...] = (jnp.dot(h, wro_ref[1], preferred_element_type=jnp.float32)
                  + bro_ref[1:2, :])


# ---------------------------------------------------------------------------
# pallas_call wrapper
# ---------------------------------------------------------------------------
def _full_spec(shape):
    ndim = len(shape)
    return pl.BlockSpec(shape, lambda i, _n=ndim: (0,) * _n)


def tsarnet_forward(params, feature_view, edge_index, edge_attr, edge_time_emb,
                    boundary_condition, batch, num_graphs):
    emb_dim = feature_view.shape[1]
    n = feature_view.shape[0]
    e = edge_index.shape[1]
    a = edge_attr.shape[1]
    t = edge_time_emb.shape[1]

    feat_pad = params["wnode"].shape[-1]
    at_pad = params["wat"].shape[1]
    out_pad = params["bro"].shape[-1]
    num_layers = params["wat"].shape[0]

    n_pad = _round_up(max(n, 8), 8)
    e_pad = _round_up(max(e, 128), 128)

    # int32 index vectors only; padded edges get sentinel n_pad (out of range)
    src = jnp.full((e_pad, 1), n_pad, jnp.int32)
    src = src.at[:e, 0].set(edge_index[0].astype(jnp.int32))        # [E_pad, 1]
    dst = jnp.full((1, e_pad), n_pad, jnp.int32)
    dst = dst.at[0, :e].set(edge_index[1].astype(jnp.int32))        # [1, E_pad]

    # lane/sublane-dense edge feature slab (edge_attr ++ edge_time_emb)
    ef = jnp.zeros((e_pad, at_pad), jnp.float32)
    ef = ef.at[:e, :a].set(edge_attr)
    ef = ef.at[:e, a:a + t].set(edge_time_emb)

    # lane-pad node-level tensors
    x0 = jnp.zeros((n_pad, feat_pad), jnp.float32).at[:n, :emb_dim].set(feature_view)
    bc = jnp.zeros((n_pad, feat_pad), jnp.float32).at[:n, :emb_dim].set(boundary_condition)

    # mean-pool matrix [G, N_pad] (padded node columns are zero)
    onehot_b = jax.nn.one_hot(batch, num_graphs, dtype=jnp.float32)  # [N, G]
    counts = jnp.maximum(jnp.sum(onehot_b, axis=0, keepdims=True), 1.0)
    pool = jnp.zeros((num_graphs, n_pad), jnp.float32).at[:, :n].set((onehot_b / counts).T)

    inputs = (src, dst, x0, ef, bc, pool,
              params["wnode"], params["wat"], params["vec"],
              params["wro"], params["bro"])

    out = pl.pallas_call(
        functools.partial(_tsarnet_kernel, emb_dim=emb_dim, num_layers=num_layers),
        out_shape=jax.ShapeDtypeStruct((num_graphs, out_pad), jnp.float32),
        grid=(1,),
        in_specs=[_full_spec(v.shape) for v in inputs],
        out_specs=_full_spec((num_graphs, out_pad)),
        compiler_params=pltpu.CompilerParams(
            dimension_semantics=("arbitrary",)),
    )(*inputs)
    return out[:, :1]                                               # [G, 1]


# ---------------------------------------------------------------------------
# Parameter init (deterministic, PyTorch-Linear-like uniform bounds),
# lane-padded + packed into a few stacked slabs.
# ---------------------------------------------------------------------------
def _uniform(key, shape, bound):
    return jax.random.uniform(key, shape, jnp.float32, -bound, bound)


def _pad2(arr, rows, cols):
    return jnp.pad(arr, ((0, rows - arr.shape[0]), (0, cols - arr.shape[1])))


def init_params(key, emb_dim, edge_attr_size, edge_time_emb_dim, num_layers,
                feat_pad=FEAT_PAD, out_pad=OUT_PAD):
    at = edge_attr_size + edge_time_emb_dim
    at_pad = _round_up(max(at, 128), 128)
    mb = float((emb_dim + at) ** -0.5)
    lb = float(emb_dim ** -0.5)

    wnode, wat, vec = [], [], []
    for _ in range(num_layers):
        key, *ks = jax.random.split(key, 6)
        # wnode[2l]   = Wx  (node-feature slice of msg_function weight, transposed)
        # wnode[2l+1] = Wl  (per-layer Linear weight, transposed)
        wnode.append(_pad2(_uniform(ks[0], (emb_dim, emb_dim), mb), feat_pad, feat_pad))
        wnode.append(_pad2(_uniform(ks[1], (emb_dim, emb_dim), lb), feat_pad, feat_pad))
        wat.append(_pad2(_uniform(ks[2], (at, emb_dim), mb), at_pad, feat_pad))
        v = jnp.zeros((8, feat_pad), jnp.float32)
        v = v.at[0, :emb_dim].set(_uniform(ks[3], (emb_dim,), mb))   # msg bias
        v = v.at[1, :emb_dim].set(_uniform(ks[4], (emb_dim,), lb))   # linear bias
        v = v.at[2, :emb_dim].set(1.0)                               # LN gamma
        # row 3 = LN beta = 0; rows 4..7 unused
        vec.append(v)

    key, k1, k2, k3, k4 = jax.random.split(key, 5)
    wro = jnp.stack([
        _pad2(_uniform(k1, (emb_dim, emb_dim), lb), feat_pad, out_pad),  # MLP W1
        _pad2(_uniform(k3, (emb_dim, 1), lb), feat_pad, out_pad),        # MLP W2
    ])
    bro = jnp.zeros((8, out_pad), jnp.float32)
    bro = bro.at[0, :emb_dim].set(_uniform(k2, (emb_dim,), lb))          # MLP b1
    bro = bro.at[1, :1].set(_uniform(k4, (1,), lb))                      # MLP b2

    params = dict(wnode=jnp.stack(wnode), wat=jnp.stack(wat),
                  vec=jnp.stack(vec), wro=wro, bro=bro)

    # LayerNorm-over-padded-lanes correctness requires padded weight / bias /
    # gamma / beta lanes to be exactly zero.
    assert bool(jnp.all(params["vec"][:, :, emb_dim:] == 0.0))
    assert bool(jnp.all(params["wnode"][:, :, emb_dim:] == 0.0))
    assert bool(jnp.all(params["wat"][:, :, emb_dim:] == 0.0))
    return params


# ---------------------------------------------------------------------------
if __name__ == "__main__":
    emb_dim = 32
    edge_attr_size = 8
    edge_time_emb_dim = 16
    num_layers = 3
    num_nodes = 16
    num_edges = 24
    num_graphs = 2

    key = jax.random.PRNGKey(0)
    kp, kx, ke, ka, kt, kb = jax.random.split(key, 6)

    params = init_params(kp, emb_dim, edge_attr_size, edge_time_emb_dim, num_layers)

    feature_view = jax.random.normal(kx, (num_nodes, emb_dim), jnp.float32)
    edge_index = jax.random.randint(ke, (2, num_edges), 0, num_nodes, jnp.int32)
    edge_attr = jax.random.normal(ka, (num_edges, edge_attr_size), jnp.float32)
    edge_time_emb = jax.random.normal(kt, (num_edges, edge_time_emb_dim), jnp.float32)
    boundary_condition = jax.random.normal(kb, (num_nodes, emb_dim), jnp.float32)
    batch = jnp.concatenate([
        jnp.zeros((num_nodes // 2,), jnp.int32),
        jnp.ones((num_nodes - num_nodes // 2,), jnp.int32),
    ])

    fwd = jax.jit(functools.partial(tsarnet_forward, num_graphs=num_graphs))
    out = fwd(params, feature_view, edge_index, edge_attr, edge_time_emb,
              boundary_condition, batch)
    out = jax.block_until_ready(out)

    assert out.shape == (num_graphs, 1), out.shape
    assert bool(jnp.all(jnp.isfinite(out)))
    print("KERNEL_OK")
</pallas_src>

<mosaic_0001>
module attributes {stable_mosaic.version = 11 : i64} {
  func.func @_tsarnet_kernel(%arg0: i32, %arg1: memref<128x1xi32, #tpu.memory_space<vmem>>, %arg2: memref<1x128xi32, #tpu.memory_space<vmem>>, %arg3: memref<16x128xf32, #tpu.memory_space<vmem>>, %arg4: memref<128x128xf32, #tpu.memory_space<vmem>>, %arg5: memref<16x128xf32, #tpu.memory_space<vmem>>, %arg6: memref<2x16xf32, #tpu.memory_space<vmem>>, %arg7: memref<6x128x128xf32, #tpu.memory_space<vmem>>, %arg8: memref<3x128x128xf32, #tpu.memory_space<vmem>>, %arg9: memref<3x8x128xf32, #tpu.memory_space<vmem>>, %arg10: memref<2x128x128xf32, #tpu.memory_space<vmem>>, %arg11: memref<8x128xf32, #tpu.memory_space<vmem>>, %arg12: memref<2x128xf32, #tpu.memory_space<vmem>>) attributes {dimension_semantics = [#tpu.dimension_semantics<arbitrary>], iteration_bounds = array<i64: 1>, scalar_prefetch = 0 : i64, scratch_operands = 0 : i64, tpu.core_type = #tpu.core_type<tc>, window_params = [{pipeline_mode = #tpu.pipeline_mode<synchronous>, transform_indices = @transform_0, window_bounds = array<i64: 128, 1>}, {pipeline_mode = #tpu.pipeline_mode<synchronous>, transform_indices = @transform_1, window_bounds = array<i64: 1, 128>}, {pipeline_mode = #tpu.pipeline_mode<synchronous>, transform_indices = @transform_2, window_bounds = array<i64: 16, 128>}, {pipeline_mode = #tpu.pipeline_mode<synchronous>, transform_indices = @transform_3, window_bounds = array<i64: 128, 128>}, {pipeline_mode = #tpu.pipeline_mode<synchronous>, transform_indices = @transform_4, window_bounds = array<i64: 16, 128>}, {pipeline_mode = #tpu.pipeline_mode<synchronous>, transform_indices = @transform_5, window_bounds = array<i64: 2, 16>}, {pipeline_mode = #tpu.pipeline_mode<synchronous>, transform_indices = @transform_6, window_bounds = array<i64: 6, 128, 128>}, {pipeline_mode = #tpu.pipeline_mode<synchronous>, transform_indices = @transform_7, window_bounds = array<i64: 3, 128, 128>}, {pipeline_mode = #tpu.pipeline_mode<synchronous>, transform_indices = @transform_8, window_bounds = array<i64: 3, 8, 128>}, {pipeline_mode = #tpu.pipeline_mode<synchronous>, transform_indices = @transform_9, window_bounds = array<i64: 2, 128, 128>}, {pipeline_mode = #tpu.pipeline_mode<synchronous>, transform_indices = @transform_10, window_bounds = array<i64: 8, 128>}, {pipeline_mode = #tpu.pipeline_mode<synchronous>, transform_indices = @transform_11, window_bounds = array<i64: 2, 128>}]} {
    %0 = tpu.iota {dimensions = array<i32: 1>} : vector<128x16xi32>
    %c0 = arith.constant 0 : index
    %c0_0 = arith.constant 0 : index
    %1 = vector.load %arg1[%c0, %c0_0] : memref<128x1xi32, #tpu.memory_space<vmem>>, vector<128x1xi32>
    %2 = vector.broadcast %1 : vector<128x1xi32> to vector<128x16xi32>
    %3 = arith.cmpi eq, %0, %2 : vector<128x16xi32>
    %4 = arith.extui %3 : vector<128x16xi1> to vector<128x16xi32>
    %5 = arith.sitofp %4 : vector<128x16xi32> to vector<128x16xf32>
    %6 = arith.truncf %5 : vector<128x16xf32> to vector<128x16xbf16>
    %7 = tpu.iota {dimensions = array<i32: 0>} : vector<16x128xi32>
    %c0_1 = arith.constant 0 : index
    %c0_2 = arith.constant 0 : index
    %8 = vector.load %arg2[%c0_1, %c0_2] : memref<1x128xi32, #tpu.memory_space<vmem>>, vector<1x128xi32>
    %9 = vector.broadcast %8 : vector<1x128xi32> to vector<16x128xi32>
    %10 = arith.cmpi eq, %7, %9 : vector<16x128xi32>
    %11 = arith.extui %10 : vector<16x128xi1> to vector<16x128xi32>
    %12 = arith.sitofp %11 : vector<16x128xi32> to vector<16x128xf32>
    %13 = arith.truncf %12 : vector<16x128xf32> to vector<16x128xbf16>
    %14 = tpu.iota {dimensions = array<i32: 1>} : vector<1x128xi32>
    %c32_i32 = arith.constant 32 : i32
    %15 = vector.broadcast %c32_i32 : i32 to vector<1x128xi32>
    %16 = arith.cmpi slt, %14, %15 : vector<1x128xi32>
    %17 = arith.extui %16 : vector<1x128xi1> to vector<1x128xi32>
    %18 = arith.sitofp %17 : vector<1x128xi32> to vector<1x128xf32>
    %c0_3 = arith.constant 0 : index
    %c0_4 = arith.constant 0 : index
    %19 = vector.load %arg4[%c0_3, %c0_4] : memref<128x128xf32, #tpu.memory_space<vmem>>, vector<128x128xf32>
    %c0_5 = arith.constant 0 : index
    %c0_6 = arith.constant 0 : index
    %20 = vector.load %arg5[%c0_5, %c0_6] : memref<16x128xf32, #tpu.memory_space<vmem>>, vector<16x128xf32>
    %c0_7 = arith.constant 0 : index
    %c0_8 = arith.constant 0 : index
    %21 = vector.load %arg3[%c0_7, %c0_8] : memref<16x128xf32, #tpu.memory_space<vmem>>, vector<16x128xf32>
    %c0_9 = arith.constant 0 : index
    %c0_10 = arith.constant 0 : index
    %c0_11 = arith.constant 0 : index
    %22 = vector.load %arg9[%c0_9, %c0_10, %c0_11] : memref<3x8x128xf32, #tpu.memory_space<vmem>>, vector<1x8x128xf32>
    %23 = vector.shape_cast %22 : vector<1x8x128xf32> to vector<8x128xf32>
    %24 = vector.extract_strided_slice %23 {offsets = [0, 0], sizes = [1, 128], strides = [1, 1]} : vector<8x128xf32> to vector<1x128xf32>
    %25 = vector.extract_strided_slice %23 {offsets = [1, 0], sizes = [1, 128], strides = [1, 1]} : vector<8x128xf32> to vector<1x128xf32>
    %26 = vector.extract_strided_slice %23 {offsets = [2, 0], sizes = [1, 128], strides = [1, 1]} : vector<8x128xf32> to vector<1x128xf32>
    %27 = vector.extract_strided_slice %23 {offsets = [3, 0], sizes = [1, 128], strides = [1, 1]} : vector<8x128xf32> to vector<1x128xf32>
    %c0_12 = arith.constant 0 : index
    %c0_13 = arith.constant 0 : index
    %c0_14 = arith.constant 0 : index
    %28 = vector.load %arg7[%c0_12, %c0_13, %c0_14] : memref<6x128x128xf32, #tpu.memory_space<vmem>>, vector<1x128x128xf32>
    %29 = vector.shape_cast %28 : vector<1x128x128xf32> to vector<128x128xf32>
    %cst = arith.constant dense<0.000000e+00> : vector<16x128xf32>
    %30 = tpu.matmul %21, %29, %cst {dimension_numbers = #tpu.dot_dimension_numbers<[1], [0], [0], [1], [0, 0, 1, 1], [], []>} : vector<16x128xf32>, vector<128x128xf32>, vector<16x128xf32> -> vector<16x128xf32>
    %31 = arith.truncf %30 : vector<16x128xf32> to vector<16x128xbf16>
    %cst_15 = arith.constant dense<0.000000e+00> : vector<128x128xf32>
    %32 = tpu.matmul %6, %31, %cst_15 {dimension_numbers = #tpu.dot_dimension_numbers<[1], [0], [0], [1], [0, 0, 1, 1], [], []>} : vector<128x16xbf16>, vector<16x128xbf16>, vector<128x128xf32> -> vector<128x128xf32>
    %c0_16 = arith.constant 0 : index
    %c0_17 = arith.constant 0 : index
    %c0_18 = arith.constant 0 : index
    %33 = vector.load %arg8[%c0_16, %c0_17, %c0_18] : memref<3x128x128xf32, #tpu.memory_space<vmem>>, vector<1x128x128xf32>
    %34 = vector.shape_cast %33 : vector<1x128x128xf32> to vector<128x128xf32>
    %cst_19 = arith.constant dense<0.000000e+00> : vector<128x128xf32>
    %35 = tpu.matmul %19, %34, %cst_19 {dimension_numbers = #tpu.dot_dimension_numbers<[1], [0], [0], [1], [0, 0, 1, 1], [], []>} : vector<128x128xf32>, vector<128x128xf32>, vector<128x128xf32> -> vector<128x128xf32>
    %36 = arith.addf %32, %35 : vector<128x128xf32>
    %37 = vector.broadcast %24 : vector<1x128xf32> to vector<128x128xf32>
    %38 = arith.addf %36, %37 : vector<128x128xf32>
    %cst_20 = arith.constant 0.000000e+00 : f32
    %39 = vector.broadcast %cst_20 : f32 to vector<128x128xf32>
    %40 = arith.maximumf %38, %39 : vector<128x128xf32>
    %41 = arith.truncf %40 : vector<128x128xf32> to vector<128x128xbf16>
    %cst_21 = arith.constant dense<0.000000e+00> : vector<16x128xf32>
    %42 = tpu.matmul %13, %41, %cst_21 {dimension_numbers = #tpu.dot_dimension_numbers<[1], [0], [0], [1], [0, 0, 1, 1], [], []>} : vector<16x128xbf16>, vector<128x128xbf16>, vector<16x128xf32> -> vector<16x128xf32>
    %43 = arith.addf %42, %20 : vector<16x128xf32>
    %c1 = arith.constant 1 : index
    %c0_22 = arith.constant 0 : index
    %c0_23 = arith.constant 0 : index
    %44 = vector.load %arg7[%c1, %c0_22, %c0_23] : memref<6x128x128xf32, #tpu.memory_space<vmem>>, vector<1x128x128xf32>
    %45 = vector.shape_cast %44 : vector<1x128x128xf32> to vector<128x128xf32>
    %cst_24 = arith.constant dense<0.000000e+00> : vector<16x128xf32>
    %46 = tpu.matmul %43, %45, %cst_24 {dimension_numbers = #tpu.dot_dimension_numbers<[1], [0], [0], [1], [0, 0, 1, 1], [], []>} : vector<16x128xf32>, vector<128x128xf32>, vector<16x128xf32> -> vector<16x128xf32>
    %47 = vector.broadcast %25 : vector<1x128xf32> to vector<16x128xf32>
    %48 = arith.addf %46, %47 : vector<16x128xf32>
    %cst_25 = arith.constant dense<0.000000e+00> : vector<16xf32>
    %49 = vector.multi_reduction <add>, %48, %cst_25 [1] : vector<16x128xf32> to vector<16xf32>
    %50 = vector.shape_cast %49 : vector<16xf32> to vector<16x1xf32>
    %cst_26 = arith.constant 3.125000e-02 : f32
    %51 = vector.broadcast %cst_26 : f32 to vector<16x1xf32>
    %52 = arith.mulf %50, %51 : vector<16x1xf32>
    %53 = vector.broadcast %52 : vector<16x1xf32> to vector<16x128xf32>
    %54 = arith.subf %48, %53 : vector<16x128xf32>
    %55 = vector.broadcast %18 : vector<1x128xf32> to vector<16x128xf32>
    %56 = arith.mulf %54, %55 : vector<16x128xf32>
    %57 = arith.mulf %56, %56 : vector<16x128xf32>
    %cst_27 = arith.constant dense<0.000000e+00> : vector<16xf32>
    %58 = vector.multi_reduction <add>, %57, %cst_27 [1] : vector<16x128xf32> to vector<16xf32>
    %59 = vector.shape_cast %58 : vector<16xf32> to vector<16x1xf32>
    %cst_28 = arith.constant 3.125000e-02 : f32
    %60 = vector.broadcast %cst_28 : f32 to vector<16x1xf32>
    %61 = arith.mulf %59, %60 : vector<16x1xf32>
    %cst_29 = arith.constant 9.99999974E-6 : f32
    %62 = vector.broadcast %cst_29 : f32 to vector<16x1xf32>
    %63 = arith.addf %61, %62 : vector<16x1xf32>
    %64 = math.rsqrt %63 : vector<16x1xf32>
    %65 = vector.broadcast %64 : vector<16x1xf32> to vector<16x128xf32>
    %66 = arith.mulf %56, %65 : vector<16x128xf32>
    %67 = vector.broadcast %26 : vector<1x128xf32> to vector<16x128xf32>
    %68 = arith.mulf %66, %67 : vector<16x128xf32>
    %69 = vector.broadcast %27 : vector<1x128xf32> to vector<16x128xf32>
    %70 = arith.addf %68, %69 : vector<16x128xf32>
    %cst_30 = arith.constant 0.000000e+00 : f32
    %71 = vector.broadcast %cst_30 : f32 to vector<16x128xf32>
    %72 = arith.maximumf %70, %71 : vector<16x128xf32>
    %c1_31 = arith.constant 1 : index
    %c0_32 = arith.constant 0 : index
    %c0_33 = arith.constant 0 : index
    %73 = vector.load %arg9[%c1_31, %c0_32, %c0_33] : memref<3x8x128xf32, #tpu.memory_space<vmem>>, vector<1x8x128xf32>
    %74 = vector.shape_cast %73 : vector<1x8x128xf32> to vector<8x128xf32>
    %75 = vector.extract_strided_slice %74 {offsets = [0, 0], sizes = [1, 128], strides = [1, 1]} : vector<8x128xf32> to vector<1x128xf32>
    %76 = vector.extract_strided_slice %74 {offsets = [1, 0], sizes = [1, 128], strides = [1, 1]} : vector<8x128xf32> to vector<1x128xf32>
    %77 = vector.extract_strided_slice %74 {offsets = [2, 0], sizes = [1, 128], strides = [1, 1]} : vector<8x128xf32> to vector<1x128xf32>
    %78 = vector.extract_strided_slice %74 {offsets = [3, 0], sizes = [1, 128], strides = [1, 1]} : vector<8x128xf32> to vector<1x128xf32>
    %c2 = arith.constant 2 : index
    %c0_34 = arith.constant 0 : index
    %c0_35 = arith.constant 0 : index
    %79 = vector.load %arg7[%c2, %c0_34, %c0_35] : memref<6x128x128xf32, #tpu.memory_space<vmem>>, vector<1x128x128xf32>
    %80 = vector.shape_cast %79 : vector<1x128x128xf32> to vector<128x128xf32>
    %cst_36 = arith.constant dense<0.000000e+00> : vector<16x128xf32>
    %81 = tpu.matmul %72, %80, %cst_36 {dimension_numbers = #tpu.dot_dimension_numbers<[1], [0], [0], [1], [0, 0, 1, 1], [], []>} : vector<16x128xf32>, vector<128x128xf32>, vector<16x128xf32> -> vector<16x128xf32>
    %82 = arith.truncf %81 : vector<16x128xf32> to vector<16x128xbf16>
    %cst_37 = arith.constant dense<0.000000e+00> : vector<128x128xf32>
    %83 = tpu.matmul %6, %82, %cst_37 {dimension_numbers = #tpu.dot_dimension_numbers<[1], [0], [0], [1], [0, 0, 1, 1], [], []>} : vector<128x16xbf16>, vector<16x128xbf16>, vector<128x128xf32> -> vector<128x128xf32>
    %c1_38 = arith.constant 1 : index
    %c0_39 = arith.constant 0 : index
    %c0_40 = arith.constant 0 : index
    %84 = vector.load %arg8[%c1_38, %c0_39, %c0_40] : memref<3x128x128xf32, #tpu.memory_space<vmem>>, vector<1x128x128xf32>
    %85 = vector.shape_cast %84 : vector<1x128x128xf32> to vector<128x128xf32>
    %cst_41 = arith.constant dense<0.000000e+00> : vector<128x128xf32>
    %86 = tpu.matmul %19, %85, %cst_41 {dimension_numbers = #tpu.dot_dimension_numbers<[1], [0], [0], [1], [0, 0, 1, 1], [], []>} : vector<128x128xf32>, vector<128x128xf32>, vector<128x128xf32> -> vector<128x128xf32>
    %87 = arith.addf %83, %86 : vector<128x128xf32>
    %88 = vector.broadcast %75 : vector<1x128xf32> to vector<128x128xf32>
    %89 = arith.addf %87, %88 : vector<128x128xf32>
    %cst_42 = arith.constant 0.000000e+00 : f32
    %90 = vector.broadcast %cst_42 : f32 to vector<128x128xf32>
    %91 = arith.maximumf %89, %90 : vector<128x128xf32>
    %92 = arith.truncf %91 : vector<128x128xf32> to vector<128x128xbf16>
    %cst_43 = arith.constant dense<0.000000e+00> : vector<16x128xf32>
    %93 = tpu.matmul %13, %92, %cst_43 {dimension_numbers = #tpu.dot_dimension_numbers<[1], [0], [0], [1], [0, 0, 1, 1], [], []>} : vector<16x128xbf16>, vector<128x128xbf16>, vector<16x128xf32> -> vector<16x128xf32>
    %94 = arith.addf %93, %20 : vector<16x128xf32>
    %c3 = arith.constant 3 : index
    %c0_44 = arith.constant 0 : index
    %c0_45 = arith.constant 0 : index
    %95 = vector.load %arg7[%c3, %c0_44, %c0_45] : memref<6x128x128xf32, #tpu.memory_space<vmem>>, vector<1x128x128xf32>
    %96 = vector.shape_cast %95 : vector<1x128x128xf32> to vector<128x128xf32>
    %cst_46 = arith.constant dense<0.000000e+00> : vector<16x128xf32>
    %97 = tpu.matmul %94, %96, %cst_46 {dimension_numbers = #tpu.dot_dimension_numbers<[1], [0], [0], [1], [0, 0, 1, 1], [], []>} : vector<16x128xf32>, vector<128x128xf32>, vector<16x128xf32> -> vector<16x128xf32>
    %98 = vector.broadcast %76 : vector<1x128xf32> to vector<16x128xf32>
    %99 = arith.addf %97, %98 : vector<16x128xf32>
    %cst_47 = arith.constant dense<0.000000e+00> : vector<16xf32>
    %100 = vector.multi_reduction <add>, %99, %cst_47 [1] : vector<16x128xf32> to vector<16xf32>
    %101 = vector.shape_cast %100 : vector<16xf32> to vector<16x1xf32>
    %cst_48 = arith.constant 3.125000e-02 : f32
    %102 = vector.broadcast %cst_48 : f32 to vector<16x1xf32>
    %103 = arith.mulf %101, %102 : vector<16x1xf32>
    %104 = vector.broadcast %103 : vector<16x1xf32> to vector<16x128xf32>
    %105 = arith.subf %99, %104 : vector<16x128xf32>
    %106 = vector.broadcast %18 : vector<1x128xf32> to vector<16x128xf32>
    %107 = arith.mulf %105, %106 : vector<16x128xf32>
    %108 = arith.mulf %107, %107 : vector<16x128xf32>
    %cst_49 = arith.constant dense<0.000000e+00> : vector<16xf32>
    %109 = vector.multi_reduction <add>, %108, %cst_49 [1] : vector<16x128xf32> to vector<16xf32>
    %110 = vector.shape_cast %109 : vector<16xf32> to vector<16x1xf32>
    %cst_50 = arith.constant 3.125000e-02 : f32
    %111 = vector.broadcast %cst_50 : f32 to vector<16x1xf32>
    %112 = arith.mulf %110, %111 : vector<16x1xf32>
    %cst_51 = arith.constant 9.99999974E-6 : f32
    %113 = vector.broadcast %cst_51 : f32 to vector<16x1xf32>
    %114 = arith.addf %112, %113 : vector<16x1xf32>
    %115 = math.rsqrt %114 : vector<16x1xf32>
    %116 = vector.broadcast %115 : vector<16x1xf32> to vector<16x128xf32>
    %117 = arith.mulf %107, %116 : vector<16x128xf32>
    %118 = vector.broadcast %77 : vector<1x128xf32> to vector<16x128xf32>
    %119 = arith.mulf %117, %118 : vector<16x128xf32>
    %120 = vector.broadcast %78 : vector<1x128xf32> to vector<16x128xf32>
    %121 = arith.addf %119, %120 : vector<16x128xf32>
    %cst_52 = arith.constant 0.000000e+00 : f32
    %122 = vector.broadcast %cst_52 : f32 to vector<16x128xf32>
    %123 = arith.maximumf %121, %122 : vector<16x128xf32>
    %c2_53 = arith.constant 2 : index
    %c0_54 = arith.constant 0 : index
    %c0_55 = arith.constant 0 : index
    %124 = vector.load %arg9[%c2_53, %c0_54, %c0_55] : memref<3x8x128xf32, #tpu.memory_space<vmem>>, vector<1x8x128xf32>
    %125 = vector.shape_cast %124 : vector<1x8x128xf32> to vector<8x128xf32>
    %126 = vector.extract_strided_slice %125 {offsets = [0, 0], sizes = [1, 128], strides = [1, 1]} : vector<8x128xf32> to vector<1x128xf32>
    %127 = vector.extract_strided_slice %125 {offsets = [1, 0], sizes = [1, 128], strides = [1, 1]} : vector<8x128xf32> to vector<1x128xf32>
    %128 = vector.extract_strided_slice %125 {offsets = [2, 0], sizes = [1, 128], strides = [1, 1]} : vector<8x128xf32> to vector<1x128xf32>
    %129 = vector.extract_strided_slice %125 {offsets = [3, 0], sizes = [1, 128], strides = [1, 1]} : vector<8x128xf32> to vector<1x128xf32>
    %c4 = arith.constant 4 : index
    %c0_56 = arith.constant 0 : index
    %c0_57 = arith.constant 0 : index
    %130 = vector.load %arg7[%c4, %c0_56, %c0_57] : memref<6x128x128xf32, #tpu.memory_space<vmem>>, vector<1x128x128xf32>
    %131 = vector.shape_cast %130 : vector<1x128x128xf32> to vector<128x128xf32>
    %cst_58 = arith.constant dense<0.000000e+00> : vector<16x128xf32>
    %132 = tpu.matmul %123, %131, %cst_58 {dimension_numbers = #tpu.dot_dimension_numbers<[1], [0], [0], [1], [0, 0, 1, 1], [], []>} : vector<16x128xf32>, vector<128x128xf32>, vector<16x128xf32> -> vector<16x128xf32>
    %133 = arith.truncf %132 : vector<16x128xf32> to vector<16x128xbf16>
    %cst_59 = arith.constant dense<0.000000e+00> : vector<128x128xf32>
    %134 = tpu.matmul %6, %133, %cst_59 {dimension_numbers = #tpu.dot_dimension_numbers<[1], [0], [0], [1], [0, 0, 1, 1], [], []>} : vector<128x16xbf16>, vector<16x128xbf16>, vector<128x128xf32> -> vector<128x128xf32>
    %c2_60 = arith.constant 2 : index
    %c0_61 = arith.constant 0 : index
    %c0_62 = arith.constant 0 : index
    %135 = vector.load %arg8[%c2_60, %c0_61, %c0_62] : memref<3x128x128xf32, #tpu.memory_space<vmem>>, vector<1x128x128xf32>
    %136 = vector.shape_cast %135 : vector<1x128x128xf32> to vector<128x128xf32>
    %cst_63 = arith.constant dense<0.000000e+00> : vector<128x128xf32>
    %137 = tpu.matmul %19, %136, %cst_63 {dimension_numbers = #tpu.dot_dimension_numbers<[1], [0], [0], [1], [0, 0, 1, 1], [], []>} : vector<128x128xf32>, vector<128x128xf32>, vector<128x128xf32> -> vector<128x128xf32>
    %138 = arith.addf %134, %137 : vector<128x128xf32>
    %139 = vector.broadcast %126 : vector<1x128xf32> to vector<128x128xf32>
    %140 = arith.addf %138, %139 : vector<128x128xf32>
    %cst_64 = arith.constant 0.000000e+00 : f32
    %141 = vector.broadcast %cst_64 : f32 to vector<128x128xf32>
    %142 = arith.maximumf %140, %141 : vector<128x128xf32>
    %143 = arith.truncf %142 : vector<128x128xf32> to vector<128x128xbf16>
    %cst_65 = arith.constant dense<0.000000e+00> : vector<16x128xf32>
    %144 = tpu.matmul %13, %143, %cst_65 {dimension_numbers = #tpu.dot_dimension_numbers<[1], [0], [0], [1], [0, 0, 1, 1], [], []>} : vector<16x128xbf16>, vector<128x128xbf16>, vector<16x128xf32> -> vector<16x128xf32>
    %145 = arith.addf %144, %20 : vector<16x128xf32>
    %c5 = arith.constant 5 : index
    %c0_66 = arith.constant 0 : index
    %c0_67 = arith.constant 0 : index
    %146 = vector.load %arg7[%c5, %c0_66, %c0_67] : memref<6x128x128xf32, #tpu.memory_space<vmem>>, vector<1x128x128xf32>
    %147 = vector.shape_cast %146 : vector<1x128x128xf32> to vector<128x128xf32>
    %cst_68 = arith.constant dense<0.000000e+00> : vector<16x128xf32>
    %148 = tpu.matmul %145, %147, %cst_68 {dimension_numbers = #tpu.dot_dimension_numbers<[1], [0], [0], [1], [0, 0, 1, 1], [], []>} : vector<16x128xf32>, vector<128x128xf32>, vector<16x128xf32> -> vector<16x128xf32>
    %149 = vector.broadcast %127 : vector<1x128xf32> to vector<16x128xf32>
    %150 = arith.addf %148, %149 : vector<16x128xf32>
    %cst_69 = arith.constant dense<0.000000e+00> : vector<16xf32>
    %151 = vector.multi_reduction <add>, %150, %cst_69 [1] : vector<16x128xf32> to vector<16xf32>
    %152 = vector.shape_cast %151 : vector<16xf32> to vector<16x1xf32>
    %cst_70 = arith.constant 3.125000e-02 : f32
    %153 = vector.broadcast %cst_70 : f32 to vector<16x1xf32>
    %154 = arith.mulf %152, %153 : vector<16x1xf32>
    %155 = vector.broadcast %154 : vector<16x1xf32> to vector<16x128xf32>
    %156 = arith.subf %150, %155 : vector<16x128xf32>
    %157 = vector.broadcast %18 : vector<1x128xf32> to vector<16x128xf32>
    %158 = arith.mulf %156, %157 : vector<16x128xf32>
    %159 = arith.mulf %158, %158 : vector<16x128xf32>
    %cst_71 = arith.constant dense<0.000000e+00> : vector<16xf32>
    %160 = vector.multi_reduction <add>, %159, %cst_71 [1] : vector<16x128xf32> to vector<16xf32>
    %161 = vector.shape_cast %160 : vector<16xf32> to vector<16x1xf32>
    %cst_72 = arith.constant 3.125000e-02 : f32
    %162 = vector.broadcast %cst_72 : f32 to vector<16x1xf32>
    %163 = arith.mulf %161, %162 : vector<16x1xf32>
    %cst_73 = arith.constant 9.99999974E-6 : f32
    %164 = vector.broadcast %cst_73 : f32 to vector<16x1xf32>
    %165 = arith.addf %163, %164 : vector<16x1xf32>
    %166 = math.rsqrt %165 : vector<16x1xf32>
    %167 = vector.broadcast %166 : vector<16x1xf32> to vector<16x128xf32>
    %168 = arith.mulf %158, %167 : vector<16x128xf32>
    %169 = vector.broadcast %128 : vector<1x128xf32> to vector<16x128xf32>
    %170 = arith.mulf %168, %169 : vector<16x128xf32>
    %171 = vector.broadcast %129 : vector<1x128xf32> to vector<16x128xf32>
    %172 = arith.addf %170, %171 : vector<16x128xf32>
    %cst_74 = arith.constant 0.000000e+00 : f32
    %173 = vector.broadcast %cst_74 : f32 to vector<16x128xf32>
    %174 = arith.maximumf %172, %173 : vector<16x128xf32>
    %c0_75 = arith.constant 0 : index
    %c0_76 = arith.constant 0 : index
    %175 = vector.load %arg6[%c0_75, %c0_76] : memref<2x16xf32, #tpu.memory_space<vmem>>, vector<2x16xf32>
    %cst_77 = arith.constant dense<0.000000e+00> : vector<2x128xf32>
    %176 = tpu.matmul %175, %174, %cst_77 {dimension_numbers = #tpu.dot_dimension_numbers<[1], [0], [0], [1], [0, 0, 1, 1], [], []>} : vector<2x16xf32>, vector<16x128xf32>, vector<2x128xf32> -> vector<2x128xf32>
    %c0_78 = arith.constant 0 : index
    %c0_79 = arith.constant 0 : index
    %c0_80 = arith.constant 0 : index
    %177 = vector.load %arg10[%c0_78, %c0_79, %c0_80] : memref<2x128x128xf32, #tpu.memory_space<vmem>>, vector<1x128x128xf32>
    %178 = vector.shape_cast %177 : vector<1x128x128xf32> to vector<128x128xf32>
    %cst_81 = arith.constant dense<0.000000e+00> : vector<2x128xf32>
    %179 = tpu.matmul %176, %178, %cst_81 {dimension_numbers = #tpu.dot_dimension_numbers<[1], [0], [0], [1], [0, 0, 1, 1], [], []>} : vector<2x128xf32>, vector<128x128xf32>, vector<2x128xf32> -> vector<2x128xf32>
    %c0_82 = arith.constant 0 : index
    %c0_83 = arith.constant 0 : index
    %180 = vector.load %arg11[%c0_82, %c0_83] : memref<8x128xf32, #tpu.memory_space<vmem>>, vector<1x128xf32>
    %181 = vector.broadcast %180 : vector<1x128xf32> to vector<2x128xf32>
    %182 = arith.addf %179, %181 : vector<2x128xf32>
    %cst_84 = arith.constant 0.000000e+00 : f32
    %183 = vector.broadcast %cst_84 : f32 to vector<2x128xf32>
    %184 = arith.maximumf %182, %183 : vector<2x128xf32>
    %c1_85 = arith.constant 1 : index
    %c0_86 = arith.constant 0 : index
    %c0_87 = arith.constant 0 : index
    %185 = vector.load %arg10[%c1_85, %c0_86, %c0_87] : memref<2x128x128xf32, #tpu.memory_space<vmem>>, vector<1x128x128xf32>
    %186 = vector.shape_cast %185 : vector<1x128x128xf32> to vector<128x128xf32>
    %cst_88 = arith.constant dense<0.000000e+00> : vector<2x128xf32>
    %187 = tpu.matmul %184, %186, %cst_88 {dimension_numbers = #tpu.dot_dimension_numbers<[1], [0], [0], [1], [0, 0, 1, 1], [], []>} : vector<2x128xf32>, vector<128x128xf32>, vector<2x128xf32> -> vector<2x128xf32>
    %c1_89 = arith.constant 1 : index
    %c0_90 = arith.constant 0 : index
    %188 = vector.load %arg11[%c1_89, %c0_90] : memref<8x128xf32, #tpu.memory_space<vmem>>, vector<1x128xf32>
    %189 = vector.broadcast %188 : vector<1x128xf32> to vector<2x128xf32>
    %190 = arith.addf %187, %189 : vector<2x128xf32>
    %c0_91 = arith.constant 0 : index
    %c0_92 = arith.constant 0 : index
    %191 = vector.load %arg12[%c0_91, %c0_92] : memref<2x128xf32, #tpu.memory_space<vmem>>, vector<2x128xf32>
    tpu.vector_store %arg12[%c0_91, %c0_92], %190 {strides = array<i32>} : memref<2x128xf32, #tpu.memory_space<vmem>>, vector<2x128xf32>,
    return
  }
  func.func @transform_0(%arg0: i32) -> (i32, i32) {
    %c0_i32 = arith.constant 0 : i32
    %c0_i32_0 = arith.constant 0 : i32
    %c0_i32_1 = arith.constant 0 : i32
    return %c0_i32, %c0_i32_0 : i32, i32
  }
  func.func @transform_1(%arg0: i32) -> (i32, i32) {
    %c0_i32 = arith.constant 0 : i32
    %c0_i32_0 = arith.constant 0 : i32
    %c0_i32_1 = arith.constant 0 : i32
    return %c0_i32, %c0_i32_0 : i32, i32
  }
  func.func @transform_2(%arg0: i32) -> (i32, i32) {
    %c0_i32 = arith.constant 0 : i32
    %c0_i32_0 = arith.constant 0 : i32
    %c0_i32_1 = arith.constant 0 : i32
    return %c0_i32, %c0_i32_0 : i32, i32
  }
  func.func @transform_3(%arg0: i32) -> (i32, i32) {
    %c0_i32 = arith.constant 0 : i32
    %c0_i32_0 = arith.constant 0 : i32
    %c0_i32_1 = arith.constant 0 : i32
    return %c0_i32, %c0_i32_0 : i32, i32
  }
  func.func @transform_4(%arg0: i32) -> (i32, i32) {
    %c0_i32 = arith.constant 0 : i32
    %c0_i32_0 = arith.constant 0 : i32
    %c0_i32_1 = arith.constant 0 : i32
    return %c0_i32, %c0_i32_0 : i32, i32
  }
  func.func @transform_5(%arg0: i32) -> (i32, i32) {
    %c0_i32 = arith.constant 0 : i32
    %c0_i32_0 = arith.constant 0 : i32
    %c0_i32_1 = arith.constant 0 : i32
    return %c0_i32, %c0_i32_0 : i32, i32
  }
  func.func @transform_6(%arg0: i32) -> (i32, i32, i32) {
    %c0_i32 = arith.constant 0 : i32
    %c0_i32_0 = arith.constant 0 : i32
    %c0_i32_1 = arith.constant 0 : i32
    %c0_i32_2 = arith.constant 0 : i32
    return %c0_i32, %c0_i32_0, %c0_i32_1 : i32, i32, i32
  }
  func.func @transform_7(%arg0: i32) -> (i32, i32, i32) {
    %c0_i32 = arith.constant 0 : i32
    %c0_i32_0 = arith.constant 0 : i32
    %c0_i32_1 = arith.constant 0 : i32
    %c0_i32_2 = arith.constant 0 : i32
    return %c0_i32, %c0_i32_0, %c0_i32_1 : i32, i32, i32
  }
  func.func @transform_8(%arg0: i32) -> (i32, i32, i32) {
    %c0_i32 = arith.constant 0 : i32
    %c0_i32_0 = arith.constant 0 : i32
    %c0_i32_1 = arith.constant 0 : i32
    %c0_i32_2 = arith.constant 0 : i32
    return %c0_i32, %c0_i32_0, %c0_i32_1 : i32, i32, i32
  }
  func.func @transform_9(%arg0: i32) -> (i32, i32, i32) {
    %c0_i32 = arith.constant 0 : i32
    %c0_i32_0 = arith.constant 0 : i32
    %c0_i32_1 = arith.constant 0 : i32
    %c0_i32_2 = arith.constant 0 : i32
    return %c0_i32, %c0_i32_0, %c0_i32_1 : i32, i32, i32
  }
  func.func @transform_10(%arg0: i32) -> (i32, i32) {
    %c0_i32 = arith.constant 0 : i32
    %c0_i32_0 = arith.constant 0 : i32
    %c0_i32_1 = arith.constant 0 : i32
    return %c0_i32, %c0_i32_0 : i32, i32
  }
  func.func @transform_11(%arg0: i32) -> (i32, i32) {
    %c0_i32 = arith.constant 0 : i32
    %c0_i32_0 = arith.constant 0 : i32
    %c0_i32_1 = arith.constant 0 : i32
    return %c0_i32, %c0_i32_0 : i32, i32
  }
}

</mosaic_0001>

<bundles_post_ra>
// kernel: tsarnet_forward.1
= control target key start
LH: loop header
LB: loop body
LE: loop exit
PB: predicated region body
PF: predicated region fallthrough
CT: control target
= control target key end

     0   :  { %16 = vsyncpa [#allocation3], 0  ;;  %s3588_s17 = smov [#allocation2]   ;;  %s4598_s0 = inlined_call_operand.vmem [shape: s32[128,1], index: 0, kind: input, shape index: {}]   ;;  %s4599_s1 = inlined_call_operand.vmem [shape: s32[1,128], index: 1, kind: input, shape index: {}]   ;;  %s4600_s2 = inlined_call_operand.vmem [shape: f32[16,128], index: 2, kind: input, shape index: {}]   ;;  %s4601_s3 = inlined_call_operand.vmem [shape: f32[128,128], index: 3, kind: input, shape index: {}]   ;;  %s4602_s4 = inlined_call_operand.vmem [shape: f32[16,128], index: 4, kind: input, shape index: {}]   ;;  %s4603_s5 = inlined_call_operand.vmem [shape: f32[2,16], index: 5, kind: input, shape index: {}]   ;;  %s4604_s6 = inlined_call_operand.hbm [shape: f32[6,128,128], index: 6, kind: input, shape index: {}]   ;;  %s4605_s7 = inlined_call_operand.vmem [shape: f32[3,128,128], index: 7, kind: input, shape index: {}]   ;;  %s4606_s8 = inlined_call_operand.vmem [shape: f32[3,8,128], index: 8, kind: input, shape index: {}]   ;;  %s4607_s9 = inlined_call_operand.vmem [shape: f32[2,128,128], index: 9, kind: input, shape index: {}]   ;;  %s4608_s10 = inlined_call_operand.vmem [shape: f32[8,128], index: 10, kind: input, shape index: {}]   ;;  %s4609_s11 = inlined_call_operand.vmem [shape: f32[2,128], index: 11, kind: output, shape index: {}]  }
   0x1   :  { %s34_s18 = sshll.u32 %s3588_s17, 4  ;;  %s3564_s21 = scalar_lea.hbm %s4604_s6, 12288  ;;  %s35_s18 = int_to_ptr.vmem [resolvable:$true] %s34_s18 }
   0x2   :  { %p3565_p0 = scmp.ne.s32.totalorder %s4604_s6, %s3564_s21  ;;  %p3568_p1 = scmp.lt.u32.totalorder %s3564_s21, %s4604_s6 }
   0x4   :  { %p3570_p2 = pnand %p3568_p1, %p3565_p0 }
   0x6   :  { %3573 = shalt.err (!%p3570_p2)
}
   0x7   :  { %s3574_s26 = scalar_lea.vmem %s35_s18, 12288  ;;  %p3579_p4 = scmp.lt.s32.totalorder %s35_s18, %s35_s18 }
   0x8   :  { %p3575_p3 = scmp.ne.s32.totalorder %s35_s18, %s3574_s26  ;;  %p3580_p5 = scmp.lt.s32.totalorder %s3574_s26, %s3574_s26 }
   0xa   :  { %p3581_p6 = por %p3580_p5, %p3579_p4 }
   0xc   :  { %p3582_p7 = pnand %p3581_p6, %p3575_p3 }
   0xe   :  { %3585 = shalt.err (!%p3582_p7)
}
   0xf   :  { %s3589_s27 = smov 128   ;;  %s3590_s28 = smov 8  }
  0x10   :  { %40 = dma.hbm_to_vmem [thread:$0]  %s4604_s6, 12288, %s35_s18, [#allocation3], %s3589_s27, %s3589_s27, %s3590_s28  }
  0x11   :  { %3586 = dma.done.wait [#allocation3], 12288  }
  0x12   :  { %3587 = vsyncadd [#allocation3], 4294955008  ;;  %v3591_v0 = vmov 0   ;;  %v214_v1 = vld [vmem:[#allocation2] sm:$0xff]  ;;  %v215_v2 = vld [vmem:[#allocation2 + $0x8] sm:$0xff]  ;;  %vm467_vm2 = vcmask 130048  }
  0x13   :  { %3533 = vset.pattern.permute.xlu1 %v3591_v0  ;;  %3532 = vset.pattern.permute.xlu0 %v3591_v0  ;;  %v216_v3 = vld [vmem:[#allocation2 + $0x10] sm:$0xff]  ;;  %v3185_v4 = vpack.c.bf16 %v215_v2, %v214_v1  ;;  %v217_v5 = vld [vmem:[#allocation2 + $0x18] sm:$0xff]  ;;  %v218_v7 = vld [vmem:[#allocation2 + $0x20] sm:$0xff] }
  0x14   :  { %v3189_v6 = vpack.c.bf16 %v217_v5, %v216_v3  ;;  %v219_v8 = vld [vmem:[#allocation2 + $0x28] sm:$0xff]  ;;  %v220_v10 = vld [vmem:[#allocation2 + $0x30] sm:$0xff]  ;;  %v211_v11 = vld [vmem:[%s4600_s2] sm:$0xff]  ;;  %v3592_v3 = vmov 0.0  }
  0x15   :  { %3186 = vmatprep.subr.bf16.mxu0 %v3185_v4  ;;  %v3193_v9 = vpack.c.bf16 %v219_v8, %v218_v7  ;;  %v221_v12 = vld [vmem:[#allocation2 + $0x38] sm:$0xff]  ;;  %2648 = vmatprep.mubr.f32.mxu0 %v211_v11  ;;  %v57_v13 = vld [vmem:[%s4598_s0 + $0x10] sm:$0xff]  ;;  %v55_v14 = vld [vmem:[%s4598_s0] sm:$0xff]  ;;  %v53_v8 = vlaneseq }
  0x16   :  { %3188 = vmatpush3.bf16.msra.mxu0 %v3185_v4  ;;  %78 = vperm.xlu1 %3533, %v57_v13   ;;  %v58_v15 = vld [vmem:[%s4598_s0 + $0x18] sm:$0xff]  ;;  %v56_v16 = vld [vmem:[%s4598_s0 + $0x8] sm:$0xff]  ;;  %v3197_v17 = vpack.c.bf16 %v221_v12, %v220_v10  ;;  %v222_v18 = vld [vmem:[#allocation2 + $0x40] sm:$0xff] }
  0x17   :  { %3190 = vmatprep.subr.bf16.mxu0 %v3189_v6  ;;  %72 = vperm.xlu0 %3532, %v55_v14   ;;  %v223_v19 = vld [vmem:[#allocation2 + $0x48] sm:$0xff]  ;;  %v306_v20 = vld [vmem:[%s4605_s7] sm:$0xff]  ;;  %v308_v26 = vld [vmem:[%s4605_s7 + $0x10] sm:$0xff]  ;;  %v3819_v13 = vand.u32 127, %v53_v8 }
  0x18   :  { %v307_v21 = vld [vmem:[%s4605_s7 + $0x8] sm:$0xff]  ;;  %v59_v23 = vld [vmem:[%s4598_s0 + $0x20] sm:$0xff]  ;;  %v3201_v25 = vpack.c.bf16 %v223_v19, %v222_v18  ;;  %v309_v27 = vld [vmem:[%s4605_s7 + $0x18] sm:$0xff] }
  0x19   :  { %v60_v22 = vld [vmem:[%s4598_s0 + $0x28] sm:$0xff]  ;;  %v3217_v24 = vpack.c.bf16 %v307_v21, %v306_v20  ;;  %v224_v28 = vld [vmem:[#allocation2 + $0x50] sm:$0xff]  ;;  %v225_v29 = vld [vmem:[#allocation2 + $0x58] sm:$0xff]  ;;  %v3221_v30 = vpack.c.bf16 %v309_v27, %v308_v26 }
  0x1a   :  { %3192 = vmatpush3.bf16.msra.mxu0 %v3189_v6  ;;  %81 = vperm.xlu1 %3533, %v58_v15   ;;  %v62_v31 = vld [vmem:[%s4598_s0 + $0x38] sm:$0xff]  ;;  %v61_v32 = vld [vmem:[%s4598_s0 + $0x30] sm:$0xff]  ;;  %v3205_v33 = vpack.c.bf16 %v225_v29, %v224_v28  ;;  %v310_v34 = vld [vmem:[%s4605_s7 + $0x20] sm:$0xff] }
  0x1b   :  { %3194 = vmatprep.subr.bf16.mxu0 %v3193_v9  ;;  %75 = vperm.xlu0 %3532, %v56_v16   ;;  %v311_v35 = vld [vmem:[%s4605_s7 + $0x28] sm:$0xff]  ;;  %v226_v36 = vld [vmem:[#allocation2 + $0x60] sm:$0xff]  ;;  %v312_v42 = vld [vmem:[%s4605_s7 + $0x30] sm:$0xff] }
  0x1c   :  { %3218 = vmatprep.subr.bf16.mxu1 %v3217_v24  ;;  %v227_v37 = vld [vmem:[#allocation2 + $0x68] sm:$0xff]  ;;  %v3225_v38 = vpack.c.bf16 %v311_v35, %v310_v34  ;;  %v63_v40 = vld [vmem:[%s4598_s0 + $0x40] sm:$0xff]  ;;  %v313_v43 = vld [vmem:[%s4605_s7 + $0x38] sm:$0xff] }
  0x1d   :  { %3220 = vmatpush3.bf16.msra.mxu1 %v3217_v24  ;;  %v64_v39 = vld [vmem:[%s4598_s0 + $0x48] sm:$0xff]  ;;  %v3209_v41 = vpack.c.bf16 %v227_v37, %v226_v36  ;;  %v228_v44 = vld [vmem:[#allocation2 + $0x70] sm:$0xff]  ;;  %v229_v45 = vld [vmem:[#allocation2 + $0x78] sm:$0xff]  ;;  %v3229_v46 = vpack.c.bf16 %v313_v43, %v312_v42 }
  0x1e   :  { %3196 = vmatpush3.bf16.msra.mxu0 %v3193_v9  ;;  %87 = vperm.xlu1 %3533, %v60_v22   ;;  %v66_v47 = vld [vmem:[%s4598_s0 + $0x58] sm:$0xff]  ;;  %v65_v48 = vld [vmem:[%s4598_s0 + $0x50] sm:$0xff]  ;;  %v3213_v49 = vpack.c.bf16 %v229_v45, %v228_v44  ;;  %v314_v50 = vld [vmem:[%s4605_s7 + $0x40] sm:$0xff] }
  0x1f   :  { %3198 = vmatprep.subr.bf16.mxu0 %v3197_v17  ;;  %84 = vperm.xlu0 %3532, %v59_v23   ;;  %v315_v51 = vld [vmem:[%s4605_s7 + $0x48] sm:$0xff]  ;;  %v67_v54 = vld [vmem:[%s4598_s0 + $0x60] sm:$0xff]  ;;  %v316_v55 = vld [vmem:[%s4605_s7 + $0x50] sm:$0xff] }
  0x20   :  { %3222 = vmatprep.subr.bf16.mxu1 %v3221_v30  ;;  %v3233_v52 = vpack.c.bf16 %v315_v51, %v314_v50  ;;  %v68_v53 = vld [vmem:[%s4598_s0 + $0x68] sm:$0xff]  ;;  %v317_v56 = vld [vmem:[%s4605_s7 + $0x58] sm:$0xff]  ;;  %v69_v60 = vld [vmem:[%s4598_s0 + $0x70] sm:$0xff] }
  0x21   :  { %3224 = vmatpush3.bf16.msra.mxu1 %v3221_v30  ;;  %v3237_v57 = vpack.c.bf16 %v317_v56, %v316_v55  ;;  %v212_v58 = vld [vmem:[%s4600_s2 + $0x8] sm:$0xff]  ;;  %v70_v59 = vld [vmem:[%s4598_s0 + $0x78] sm:$0xff]  ;;  %v318_v61 = vld [vmem:[%s4605_s7 + $0x60] sm:$0xff] }
  0x22   :  { %3200 = vmatpush3.bf16.msra.mxu0 %v3197_v17  ;;  %93 = vperm.xlu1 %3533, %v62_v31   ;;  %v319_v62 = vld [vmem:[%s4605_s7 + $0x68] sm:$0xff]  ;;  %v320_v0 = vld [vmem:[%s4605_s7 + $0x70] sm:$0xff]  ;;  %v321_v1 = vld [vmem:[%s4605_s7 + $0x78] sm:$0xff] }
  0x23   :  { %3202 = vmatprep.subr.bf16.mxu0 %v3201_v25  ;;  %90 = vperm.xlu0 %3532, %v61_v32   ;;  %v3241_v63 = vpack.c.bf16 %v319_v62, %v318_v61  ;;  %v3245_v2 = vpack.c.bf16 %v321_v1, %v320_v0  ;;  %v3774_v4 = vld [vmem:[%s4601_s3] sm:$0xff]  ;;  %v3780_v5 = vld [vmem:[%s4601_s3 + $0x8] sm:$0xff]  ;;  %v3786_v6 = vld [vmem:[%s4601_s3 + $0x10] sm:$0xff] }
  0x24   :  { %3226 = vmatprep.subr.bf16.mxu1 %v3225_v38  ;;  %2683 = vmatprep.mubr.f32.mxu1 %v3774_v4  ;;  %v3791_v7 = vld [vmem:[%s4601_s3 + $0x18] sm:$0xff]  ;;  %v3798_v9 = vld [vmem:[%s4601_s3 + $0x20] sm:$0xff]  ;;  %v3803_v10 = vld [vmem:[%s4601_s3 + $0x28] sm:$0xff] }
  0x25   :  { %3228 = vmatpush3.bf16.msra.mxu1 %v3225_v38  ;;  %v3808_v11 = vld [vmem:[%s4601_s3 + $0x30] sm:$0xff]  ;;  %v3816_v12 = vld [vmem:[%s4601_s3 + $0x38] sm:$0xff]  ;;  %v3826_v15 = vld [vmem:[%s4601_s3 + $0x40] sm:$0xff] }
  0x26   :  { %3204 = vmatpush3.bf16.msra.mxu0 %v3201_v25  ;;  %99 = vperm.xlu1 %3533, %v64_v39   ;;  %v3831_v16 = vld [vmem:[%s4601_s3 + $0x48] sm:$0xff]  ;;  %v3836_v17 = vld [vmem:[%s4601_s3 + $0x50] sm:$0xff]  ;;  %v3845_v20 = vld [vmem:[%s4601_s3 + $0x58] sm:$0xff] }
  0x27   :  { %3206 = vmatprep.subr.bf16.mxu0 %v3205_v33  ;;  %96 = vperm.xlu0 %3532, %v63_v40   ;;  %v3857_v23 = vld [vmem:[%s4601_s3 + $0x60] sm:$0xff]  ;;  %v3862_v24 = vld [vmem:[%s4601_s3 + $0x68] sm:$0xff]  ;;  %v3867_v25 = vld [vmem:[%s4601_s3 + $0x70] sm:$0xff] }
  0x28   :  { %3230 = vmatprep.subr.bf16.mxu1 %v3229_v46  ;;  %v3875_v26 = vld [vmem:[%s4601_s3 + $0x78] sm:$0xff] }
  0x29   :  { %3232 = vmatpush3.bf16.msra.mxu1 %v3229_v46 }
  0x2a   :  { %3208 = vmatpush3.bf16.msra.mxu0 %v3205_v33  ;;  %105 = vperm.xlu1 %3533, %v66_v47  }
  0x2b   :  { %3210 = vmatprep.subr.bf16.mxu0 %v3209_v41  ;;  %102 = vperm.xlu0 %3532, %v65_v48  }
  0x2c   :  { %3234 = vmatprep.subr.bf16.mxu1 %v3233_v52 }
  0x2d   :  { %3236 = vmatpush3.bf16.msra.mxu1 %v3233_v52 }
  0x2e   :  { %3212 = vmatpush3.bf16.msra.mxu0 %v3209_v41  ;;  %111 = vperm.xlu1 %3533, %v68_v53  }
  0x2f   :  { %3214 = vmatprep.subr.bf16.mxu0 %v3213_v49  ;;  %108 = vperm.xlu0 %3532, %v67_v54  }
  0x30   :  { %3238 = vmatprep.subr.bf16.mxu1 %v3237_v57 }
  0x31   :  { %3240 = vmatpush3.bf16.msra.mxu1 %v3237_v57 }
  0x32   :  { %3216 = vmatpush3.bf16.msra.mxu0 %v3213_v49  ;;  %117 = vperm.xlu1 %3533, %v70_v59  }
  0x33   :  { %114 = vperm.xlu0 %3532, %v69_v60   ;;  %3242 = vmatprep.subr.bf16.mxu1 %v3241_v63 }
  0x35   :  { %2649 = vmatmul.mubr.f32.vlgmr.msra.gmra.mrb[0].mxu0 %v212_v58  ;;  %3244 = vmatpush3.bf16.msra.mxu1 %v3241_v63 }
  0x36   :  { %3246 = vmatprep.subr.bf16.mxu1 %v3245_v2 }
  0x39   :  { %3248 = vmatpush3.bf16.msra.mxu1 %v3245_v2 }
  0x3a   :  { %2725 = vmatprep.subr.bf16.mxu1 %v3592_v3 }
  0x3c   :  { %2684 = vmatmul.mubr.f32.vlgmr.msra.gmra.mrb[0].mxu1 %v3780_v5 }
  0x3d   :  { %2686 = vmatprep.mubr.f32.mxu1 %v3786_v6 }
  0x40   :  { %2687 = vmatmul.mubr.f32.gmra.mrb[2].mxu1 %v3791_v7 }
  0x41   :  { %2689 = vmatprep.mubr.f32.mxu1 %v3798_v9 }
  0x44   :  { %2690 = vmatmul.mubr.f32.gmra.mrb[4].mxu1 %v3803_v10 }
  0x45   :  { %2692 = vmatprep.mubr.f32.mxu1 %v3808_v11 }
  0x48   :  { %2693 = vmatmul.mubr.f32.gmra.mrb[6].mxu1 %v3816_v12 }
  0x49   :  { %2695 = vmatprep.mubr.f32.mxu1 %v3826_v15 }
  0x4c   :  { %2696 = vmatmul.mubr.f32.gmra.mrb[8].mxu1 %v3831_v16 }
  0x4d   :  { %2698 = vmatprep.mubr.f32.mxu1 %v3836_v17 }
  0x50   :  { %2699 = vmatmul.mubr.f32.gmra.mrb[10].mxu1 %v3845_v20 }
  0x51   :  { %2701 = vmatprep.mubr.f32.mxu1 %v3857_v23 }
  0x54   :  { %2702 = vmatmul.mubr.f32.gmra.mrb[12].mxu1 %v3862_v24 }
  0x55   :  { %2704 = vmatprep.mubr.f32.mxu1 %v3867_v25 }
  0x58   :  { %2705 = vmatmul.mubr.f32.gmra.mrb[14].mxu1 %v3875_v26 }
  0x95   :  { %v79_v27 = vpop.permute.xlu1 %78 }
  0x96   :  { %v73_v14 = vpop.permute.xlu0 %72  ;;  %vm121_vm3 = vcmp.eq.s32.totalorder %v3819_v13, %v79_v27 }
  0x97   :  { %vm119_vm0 = vcmp.eq.s32.totalorder %v3819_v13, %v73_v14  ;;  %v2220_v36 = vsel %vm121_vm3, 1.0, %v3592_v3 }
  0x98   :  { %v2218_v18 = vsel %vm119_vm0, 1.0, %v3592_v3 }
  0x99   :  { %v82_v28 = vpop.permute.xlu1 %81 }
  0x9a   :  { %v76_v19 = vpop.permute.xlu0 %75  ;;  %vm122_vm4 = vcmp.eq.s32.totalorder %v3819_v13, %v82_v28 }
  0x9b   :  { %vm120_vm1 = vcmp.eq.s32.totalorder %v3819_v13, %v76_v19  ;;  %v2221_v37 = vsel %vm122_vm4, 1.0, %v3592_v3 }
  0x9c   :  { %v2219_v21 = vsel %vm120_vm1, 1.0, %v3592_v3  ;;  %v3886_v42 = vpack.c.bf16 %v2221_v37, %v2220_v36  ;;  %vm3593_vm1 = vmmov 0   ;;  %v675_v37 = vld [vmem:[#allocation2 + $0x80] sm:$0xff] }
  0x9d   :  { %v3849_v22 = vpack.c.bf16 %v2219_v21, %v2218_v18  ;;  %v88_v29 = vpop.permute.xlu1 %87  ;;  %2741 = vmatprep.mubr.msk.bf16.mxu1 %vm3593_vm1, %v3592_v3 }
  0x9e   :  { %v85_v30 = vpop.permute.xlu0 %84  ;;  %vm124_vm5 = vcmp.eq.s32.totalorder %v3819_v13, %v88_v29 }
  0x9f   :  { %2709 = vmatprep.mubr.msk.bf16.mxu0 %vm467_vm2, %v3849_v22  ;;  %vm123_vm6 = vcmp.eq.s32.totalorder %v3819_v13, %v85_v30  ;;  %v2223_v40 = vsel %vm124_vm5, 1.0, %v3592_v3 }
  0xa0   :  { %v2222_v41 = vsel %vm123_vm6, 1.0, %v3592_v3  ;;  %vm190_vm6 = vcmp.lt.s32.totalorder %v3819_v13, 32 }
  0xa1   :  { %v94_v31 = vpop.permute.xlu1 %93  ;;  %v3888_v43 = vpack.c.bf16 %v2223_v40, %v2222_v41  ;;  %v678_v41 = vld [vmem:[#allocation2 + $0x98] sm:$0xff] }
  0xa2   :  { %v91_v32 = vpop.permute.xlu0 %90  ;;  %vm126_vm7 = vcmp.eq.s32.totalorder %v3819_v13, %v94_v31 }
  0xa3   :  { %vm125_vm8 = vcmp.eq.s32.totalorder %v3819_v13, %v91_v32  ;;  %v2225_v46 = vsel %vm126_vm7, 1.0, %v3592_v3 }
  0xa4   :  { %v2224_v47 = vsel %vm125_vm8, 1.0, %v3592_v3 }
  0xa5   :  { %v100_v38 = vpop.permute.xlu1 %99  ;;  %v3902_v50 = vpack.c.bf16 %v2225_v46, %v2224_v47  ;;  %v680_v46 = vld [vmem:[#allocation2 + $0xa8] sm:$0xff] }
  0xa6   :  { %v97_v39 = vpop.permute.xlu0 %96  ;;  %vm128_vm9 = vcmp.eq.s32.totalorder %v3819_v13, %v100_v38  ;;  %v676_v38 = vld [vmem:[#allocation2 + $0x88] sm:$0xff] }
  0xa7   :  { %vm127_vm10 = vcmp.eq.s32.totalorder %v3819_v13, %v97_v39  ;;  %v2227_v48 = vsel %vm128_vm9, 1.0, %v3592_v3  ;;  %v677_v39 = vld [vmem:[#allocation2 + $0x90] sm:$0xff]  ;;  %v3249_v40 = vpack.c.bf16 %v676_v38, %v675_v37  ;;  %v3963_v37 = vshrl.u32 %v53_v8, 7 }
  0xa8   :  { %v2226_v49 = vsel %vm127_vm10, 1.0, %v3592_v3 }
  0xa9   :  { %v106_v44 = vpop.permute.xlu1 %105  ;;  %v3904_v51 = vpack.c.bf16 %v2227_v48, %v2226_v49  ;;  %v681_v48 = vld [vmem:[#allocation2 + $0xb0] sm:$0xff]  ;;  %v682_v49 = vld [vmem:[#allocation2 + $0xb8] sm:$0xff]  ;;  %v3966_v38 = vsub.s32 0, %v3963_v37 }
  0xaa   :  { %v103_v45 = vpop.permute.xlu0 %102  ;;  %vm130_vm11 = vcmp.eq.s32.totalorder %v3819_v13, %v106_v44  ;;  %v3253_v44 = vpack.c.bf16 %v678_v41, %v677_v39  ;;  %v3971_v39 = vld [vmem:[%s4606_s8] sm:$0xff] }
  0xab   :  { %vm129_vm12 = vcmp.eq.s32.totalorder %v3819_v13, %v103_v45  ;;  %v2229_v54 = vsel %vm130_vm11, 1.0, %v3592_v3  ;;  %v679_v45 = vld [vmem:[#allocation2 + $0xa0] sm:$0xff] }
  0xac   :  { %v2228_v55 = vsel %vm129_vm12, 1.0, %v3592_v3  ;;  %v3257_v47 = vpack.c.bf16 %v680_v46, %v679_v45 }
  0xad   :  { %v112_v52 = vpop.permute.xlu1 %111  ;;  %v3918_v60 = vpack.c.bf16 %v2229_v54, %v2228_v55  ;;  %v684_v54 = vld [vmem:[#allocation2 + $0xc8] sm:$0xff] }
  0xae   :  { %v109_v53 = vpop.permute.xlu0 %108  ;;  %vm132_vm13 = vcmp.eq.s32.totalorder %v3819_v13, %v112_v52  ;;  %v3261_v52 = vpack.c.bf16 %v682_v49, %v681_v48 }
  0xaf   :  { %vm131_vm14 = vcmp.eq.s32.totalorder %v3819_v13, %v109_v53  ;;  %v2231_v56 = vsel %vm132_vm13, 1.0, %v3592_v3  ;;  %v683_v53 = vld [vmem:[#allocation2 + $0xc0] sm:$0xff] }
  0xb0   :  { %v2230_v57 = vsel %vm131_vm14, 1.0, %v3592_v3  ;;  %v3265_v55 = vpack.c.bf16 %v684_v54, %v683_v53 }
  0xb1   :  { %v118_v58 = vpop.permute.xlu1 %117  ;;  %v3920_v61 = vpack.c.bf16 %v2231_v56, %v2230_v57  ;;  %v685_v56 = vld [vmem:[#allocation2 + $0xd0] sm:$0xff]  ;;  %v686_v57 = vld [vmem:[#allocation2 + $0xd8] sm:$0xff] }
  0xb2   :  { %v115_v59 = vpop.permute.xlu0 %114  ;;  %vm134_vm15 = vcmp.eq.s32.totalorder %v3819_v13, %v118_v58  ;;  %v3269_v58 = vpack.c.bf16 %v686_v57, %v685_v56 }
  0xb3   :  { %vm133_vm0 = vcmp.eq.s32.totalorder %v3819_v13, %v115_v59  ;;  %v2233_v62 = vsel %vm134_vm15, 1.0, %v3592_v3  ;;  %v687_v59 = vld [vmem:[#allocation2 + $0xe0] sm:$0xff] }
  0xb4   :  { %v2232_v63 = vsel %vm133_vm0, 1.0, %v3592_v3 }
  0xb5   :  { %v3930_v0 = vpack.c.bf16 %v2233_v62, %v2232_v63  ;;  %v688_v62 = vld [vmem:[#allocation2 + $0xe8] sm:$0xff] }
  0xb6   :  { %v3273_v63 = vpack.c.bf16 %v688_v62, %v687_v59 }
 0x108   :  { %v2650_v33 = vpop.f32.mrb[0].mxu0 }
 0x109   :  { %v296_v34 = vpop.f32.mrb[1].mxu0 }
 0x10a   :  { %v305_v35 = vpack.c.bf16 %v2650_v33, %v296_v34 }
 0x10c   :  { %2707 = vmatprep.subr.bf16.mxu0 %v305_v35 }
 0x10d   :  { %2708 = vmatpush3.bf16.msra.mxu0 %v305_v35 }
 0x10e   :  { %3250 = vmatprep.subr.bf16.mxu0 %v3249_v40 }
 0x10f   :  { %v3934_v1 = vpop.f32.mrb[0].mxu1 }
 0x110   :  { %2710 = vmatmul.mubr.msk.bf16.vlgmr.msra.gmra.mrb[4].mxu0 %vm467_vm2, %v3886_v42  ;;  %v388_v2 = vpop.f32.mrb[1].mxu1 }
 0x111   :  { %2713 = vmatprep.mubr.msk.bf16.mxu0 %vm467_vm2, %v3888_v43  ;;  %3252 = vmatpush3.bf16.msra.mxu0 %v3249_v40  ;;  %v3975_v40 = vrot.slane %v3971_v39, %v3966_v38 }
 0x112   :  { %3254 = vmatprep.subr.bf16.mxu0 %v3253_v44 }
 0x113   :  { %v2688_v14 = vpop.f32.mrb[2].mxu1 }
 0x114   :  { %v398_v18 = vpop.f32.mrb[3].mxu1 }
 0x115   :  { %3256 = vmatpush3.bf16.msra.mxu0 %v3253_v44 }
 0x116   :  { %3258 = vmatprep.subr.bf16.mxu0 %v3257_v47 }
 0x117   :  { %v3936_v19 = vpop.f32.mrb[4].mxu1 }
 0x118   :  { %2714 = vmatmul.mubr.msk.bf16.gmra.mrb[8].mxu0 %vm467_vm2, %v3902_v50  ;;  %v3938_v21 = vpop.f32.mrb[5].mxu1 }
 0x119   :  { %2717 = vmatprep.mubr.msk.bf16.mxu0 %vm467_vm2, %v3904_v51  ;;  %3260 = vmatpush3.bf16.msra.mxu0 %v3257_v47 }
 0x11a   :  { %3262 = vmatprep.subr.bf16.mxu0 %v3261_v52 }
 0x11b   :  { %v3940_v27 = vpop.f32.mrb[6].mxu1 }
 0x11c   :  { %v3942_v28 = vpop.f32.mrb[7].mxu1 }
 0x11d   :  { %3264 = vmatpush3.bf16.msra.mxu0 %v3261_v52 }
 0x11e   :  { %3266 = vmatprep.subr.bf16.mxu0 %v3265_v55 }
 0x11f   :  { %v3944_v29 = vpop.f32.mrb[8].mxu1 }
 0x120   :  { %2718 = vmatmul.mubr.msk.bf16.gmra.mrb[12].mxu0 %vm467_vm2, %v3918_v60  ;;  %v3946_v30 = vpop.f32.mrb[9].mxu1 }
 0x121   :  { %2721 = vmatprep.mubr.msk.bf16.mxu0 %vm467_vm2, %v3920_v61  ;;  %3268 = vmatpush3.bf16.msra.mxu0 %v3265_v55 }
 0x122   :  { %3270 = vmatprep.subr.bf16.mxu0 %v3269_v58 }
 0x123   :  { %v3948_v31 = vpop.f32.mrb[10].mxu1 }
 0x124   :  { %v3950_v32 = vpop.f32.mrb[11].mxu1 }
 0x125   :  { %3272 = vmatpush3.bf16.msra.mxu0 %v3269_v58 }
 0x126   :  { %3274 = vmatprep.subr.bf16.mxu0 %v3273_v63 }
 0x127   :  { %v3952_v33 = vpop.f32.mrb[12].mxu1 }
 0x128   :  { %2722 = vmatmul.mubr.msk.bf16.gmra.mrb[16].mxu0 %vm467_vm2, %v3930_v0  ;;  %v3954_v34 = vpop.f32.mrb[13].mxu1 }
 0x129   :  { %3276 = vmatpush3.bf16.msra.mxu0 %v3273_v63 }
 0x12b   :  { %v3956_v35 = vpop.f32.mrb[14].mxu1 }
 0x12c   :  { %v3958_v36 = vpop.f32.mrb[15].mxu1 }
 0x1e3   :  { %v2711_v41 = vpop.f32.mrb[4].mxu0 }
 0x1e4   :  { %v535_v44 = vadd.f32 %v2711_v41, %v398_v18  ;;  %v526_v45 = vpop.f32.mrb[5].mxu0 }
 0x1e5   :  { %v527_v46 = vadd.f32 %v526_v45, %v388_v2  ;;  %v2712_v47 = vpop.f32.mrb[6].mxu0 }
 0x1e6   :  { %v595_v8 = vadd.f32 %v3975_v40, %v535_v44  ;;  %v538_v48 = vadd.f32 %v2712_v47, %v2688_v14  ;;  %v529_v49 = vpop.f32.mrb[7].mxu0 }
 0x1e7   :  { %v593_v52 = vadd.f32 %v3975_v40, %v527_v46  ;;  %v530_v53 = vadd.f32 %v3934_v1, %v529_v49 }
 0x1e8   :  { %v596_v54 = vadd.f32 %v3975_v40, %v538_v48  ;;  %v611_v56 = vmax.f32 %v595_v8, 0.0 }
 0x1e9   :  { %v594_v55 = vadd.f32 %v3975_v40, %v530_v53  ;;  %v609_v58 = vmax.f32 %v593_v52, 0.0 }
 0x1ea   :  { %v612_v57 = vmax.f32 %v596_v54, 0.0 }
 0x1eb   :  { %v610_v59 = vmax.f32 %v594_v55, 0.0  ;;  %v2715_v18 = vpop.f32.mrb[8].mxu0 }
 0x1ec   :  { %v626_v62 = vpack.c.bf16 %v612_v57, %v611_v56  ;;  %v551_v2 = vadd.f32 %v2715_v18, %v3942_v28  ;;  %v542_v63 = vpop.f32.mrb[9].mxu0 }
 0x1ed   :  { %v625_v41 = vpack.c.bf16 %v610_v59, %v609_v58  ;;  %v543_v14 = vadd.f32 %v542_v63, %v3938_v21  ;;  %v2716_v44 = vpop.f32.mrb[10].mxu0 }
 0x1ee   :  { %v599_v45 = vadd.f32 %v3975_v40, %v551_v2  ;;  %v554_v1 = vadd.f32 %v2716_v44, %v3940_v27  ;;  %v545_v46 = vpop.f32.mrb[11].mxu0 }
 0x1ef   :  { %v597_v47 = vadd.f32 %v3975_v40, %v543_v14  ;;  %v546_v8 = vadd.f32 %v3936_v19, %v545_v46  ;;  %2726 = vmatpush3.bf16.msra.mxu1 %v625_v41 }
 0x1f0   :  { %v600_v48 = vadd.f32 %v3975_v40, %v554_v1  ;;  %2727 = vmatprep.subr.bf16.mxu1 %v3592_v3  ;;  %v615_v49 = vmax.f32 %v599_v45, 0.0 }
 0x1f1   :  { %v598_v28 = vadd.f32 %v3975_v40, %v546_v8  ;;  %v613_v21 = vmax.f32 %v597_v47, 0.0 }
 0x1f2   :  { %v616_v52 = vmax.f32 %v600_v48, 0.0 }
 0x1f3   :  { %v614_v53 = vmax.f32 %v598_v28, 0.0  ;;  %v2719_v54 = vpop.f32.mrb[12].mxu0  ;;  %2728 = vmatpush3.bf16.msra.mxu1 %v626_v62 }
 0x1f4   :  { %v628_v55 = vpack.c.bf16 %v616_v52, %v615_v49  ;;  %v567_v27 = vadd.f32 %v2719_v54, %v3950_v32  ;;  %v558_v56 = vpop.f32.mrb[13].mxu0  ;;  %2729 = vmatprep.subr.bf16.mxu1 %v3592_v3 }
 0x1f5   :  { %v627_v19 = vpack.c.bf16 %v614_v53, %v613_v21  ;;  %v559_v57 = vadd.f32 %v558_v56, %v3946_v30  ;;  %v2720_v58 = vpop.f32.mrb[14].mxu0 }
 0x1f6   :  { %v603_v59 = vadd.f32 %v3975_v40, %v567_v27  ;;  %v570_v18 = vadd.f32 %v2720_v58, %v3948_v31  ;;  %v561_v2 = vpop.f32.mrb[15].mxu0  ;;  %v3594_v58 = vmov 1.0|1.0  }
 0x1f7   :  { %v601_v63 = vadd.f32 %v3975_v40, %v559_v57  ;;  %v562_v41 = vadd.f32 %v3944_v29, %v561_v2  ;;  %2730 = vmatpush3.bf16.msra.mxu1 %v627_v19 }
 0x1f8   :  { %v604_v62 = vadd.f32 %v3975_v40, %v570_v18  ;;  %2731 = vmatprep.subr.bf16.mxu1 %v3592_v3  ;;  %v619_v14 = vmax.f32 %v603_v59, 0.0  ;;  %v689_v59 = vld [vmem:[#allocation2 + $0xf0] sm:$0xff]  ;;  %v690_v18 = vld [vmem:[#allocation2 + $0xf8] sm:$0xff] }
 0x1f9   :  { %v602_v32 = vadd.f32 %v3975_v40, %v562_v41  ;;  %v617_v30 = vmax.f32 %v601_v63, 0.0  ;;  %v3277_v2 = vpack.c.bf16 %v690_v18, %v689_v59  ;;  %v4028_v63 = vld [vmem:[%s4602_s4] sm:$0xff]  ;;  %v816_v59 = vld [vmem:[#allocation2 + $0x128] sm:$0xff] }
 0x1fa   :  { %v620_v44 = vmax.f32 %v604_v62, 0.0  ;;  %v4033_v62 = vld [vmem:[%s4602_s4 + $0x8] sm:$0xff] }
 0x1fb   :  { %v618_v45 = vmax.f32 %v602_v32, 0.0  ;;  %v2723_v1 = vpop.f32.mrb[16].mxu0  ;;  %2732 = vmatpush3.bf16.msra.mxu1 %v628_v55  ;;  %3278 = vmatprep.subr.bf16.mxu0 %v3277_v2 }
 0x1fc   :  { %v630_v46 = vpack.c.bf16 %v620_v44, %v619_v14  ;;  %v583_v31 = vadd.f32 %v2723_v1, %v3958_v36  ;;  %v574_v47 = vpop.f32.mrb[17].mxu0  ;;  %2733 = vmatprep.subr.bf16.mxu1 %v3592_v3  ;;  %3280 = vmatpush3.bf16.msra.mxu0 %v3277_v2  ;;  %v4039_v1 = vsub.s32 1, %v3963_v37  ;;  %v817_v2 = vld [vmem:[#allocation2 + $0x130] sm:$0xff] }
 0x1fd   :  { %v629_v29 = vpack.c.bf16 %v618_v45, %v617_v30  ;;  %v575_v8 = vadd.f32 %v574_v47, %v3954_v34  ;;  %v2724_v48 = vpop.f32.mrb[18].mxu0 }
 0x1fe   :  { %v607_v28 = vadd.f32 %v3975_v40, %v583_v31  ;;  %v586_v49 = vadd.f32 %v2724_v48, %v3956_v35  ;;  %v577_v52 = vpop.f32.mrb[19].mxu0  ;;  %v177_v35 = vadd.s32 8, %v3963_v37  ;;  %v811_v48 = vld [vmem:[#allocation2 + $0x100] sm:$0xff] }
 0x1ff   :  { %v605_v21 = vadd.f32 %v3975_v40, %v575_v8  ;;  %v578_v53 = vadd.f32 %v3952_v33, %v577_v52  ;;  %2734 = vmatpush3.bf16.msra.mxu1 %v629_v29  ;;  %v2234_v33 = vld [vmem:[%s4599_s1] ss:$0 sm:$0xff] }
 0x200   :  { %v608_v54 = vadd.f32 %v3975_v40, %v586_v49  ;;  %2735 = vmatprep.subr.bf16.mxu1 %v3592_v3  ;;  %v623_v55 = vmax.f32 %v607_v28, 0.0  ;;  %vm183_vm3 = vcmp.eq.s32.totalorder %v3963_v37, %v2234_v33  ;;  %vm184_vm4 = vcmp.eq.s32.totalorder %v177_v35, %v2234_v33  ;;  %v812_v28 = vld [vmem:[#allocation2 + $0x108] sm:$0xff]  ;;  %v813_v49 = vld [vmem:[#allocation2 + $0x110] sm:$0xff]  ;;  %v815_v33 = vld [vmem:[#allocation2 + $0x120] sm:$0xff] }
 0x201   :  { %v606_v36 = vadd.f32 %v3975_v40, %v578_v53  ;;  %v621_v34 = vmax.f32 %v605_v21, 0.0  ;;  %vm4018_vm5 = vmpackc.low %vm184_vm4, %vm183_vm3  ;;  %v3281_v52 = vpack.c.bf16 %v812_v28, %v811_v48  ;;  %v814_v21 = vld [vmem:[#allocation2 + $0x118] sm:$0xff]  ;;  %v3289_v18 = vpack.c.bf16 %v816_v59, %v815_v33  ;;  %v825_v48 = vld [vmem:[#allocation2 + $0x170] sm:$0xff] }
 0x202   :  { %v624_v27 = vmax.f32 %v608_v54, 0.0  ;;  %v3285_v53 = vpack.c.bf16 %v814_v21, %v813_v49  ;;  %v826_v28 = vld [vmem:[#allocation2 + $0x178] sm:$0xff]  ;;  %v2250_v21 = vld [vmem:[%s4605_s7 + $0x88] sm:$0xff]  ;;  %v2257_v59 = vld [vmem:[%s4605_s7 + $0xc0] sm:$0xff] }
 0x203   :  { %v622_v56 = vmax.f32 %v606_v36, 0.0  ;;  %2736 = vmatpush3.bf16.msra.mxu1 %v630_v46  ;;  %v694_v46 = vrot.slane %v3971_v39, %v4039_v1  ;;  %v3309_v49 = vpack.c.bf16 %v826_v28, %v825_v48  ;;  %v3563_v40 = vld [vmem:[%s4602_s4 + $0x8] sm:$0xff] }
 0x204   :  { %v632_v19 = vpack.c.bf16 %v624_v27, %v623_v55  ;;  %2737 = vmatprep.subr.bf16.mxu1 %v3592_v3  ;;  %v4045_v27 = vsel %vm190_vm6, 1.0, %v3592_v3 }
 0x205   :  { %v631_v57 = vpack.c.bf16 %v622_v56, %v621_v34 }
 0x207   :  { %2738 = vmatpush3.bf16.msra.mxu1 %v631_v57 }
 0x208   :  { %2739 = vmatprep.subr.bf16.mxu1 %v3592_v3 }
 0x20b   :  { %2740 = vmatpush3.bf16.msra.mxu1 %v632_v19 }
 0x20c   :  { %3282 = vmatprep.subr.bf16.mxu1 %v3281_v52 }
 0x20e   :  { %2742 = vmatmul.mubr.msk.bf16.vlgmr.msra.gmra.mrb[16].mxu1 %vm4018_vm5, %v3594_v58 }
 0x20f   :  { %3284 = vmatpush3.bf16.msra.mxu1 %v3281_v52  ;;  %v2249_v52 = vld [vmem:[%s4605_s7 + $0x80] sm:$0xff] }
 0x210   :  { %3286 = vmatprep.subr.bf16.mxu1 %v3285_v53 }
 0x213   :  { %3288 = vmatpush3.bf16.msra.mxu1 %v3285_v53  ;;  %v2251_v53 = vld [vmem:[%s4605_s7 + $0x90] sm:$0xff] }
 0x214   :  { %3290 = vmatprep.subr.bf16.mxu1 %v3289_v18 }
 0x217   :  { %3292 = vmatpush3.bf16.msra.mxu1 %v3289_v18  ;;  %v2258_v18 = vld [vmem:[%s4605_s7 + $0xc8] sm:$0xff] }
 0x2e1   :  { %v667_v41 = vpop.f32.mrb[16].mxu1 }
 0x2e2   :  { %v668_v32 = vadd.f32 %v667_v41, %v4028_v63  ;;  %v2743_v14 = vpop.f32.mrb[17].mxu1  ;;  %v818_v41 = vld [vmem:[#allocation2 + $0x138] sm:$0xff] }
 0x2e3   :  { %v670_v44 = vpop.f32.mrb[18].mxu1  ;;  %v819_v14 = vld [vmem:[#allocation2 + $0x140] sm:$0xff] }
 0x2e4   :  { %v671_v30 = vadd.f32 %v670_v44, %v4033_v62  ;;  %v2744_v45 = vpop.f32.mrb[19].mxu1  ;;  %2777 = vmatprep.mubr.f32.mxu0 %v668_v32  ;;  %v3293_v32 = vpack.c.bf16 %v818_v41, %v817_v2  ;;  %v820_v44 = vld [vmem:[#allocation2 + $0x148] sm:$0xff]  ;;  %v3329_v2 = vpack.c.bf16 %v2258_v18, %v2257_v59  ;;  %v2259_v41 = vld [vmem:[%s4605_s7 + $0xd0] sm:$0xff] }
 0x2e5   :  { %v3297_v45 = vpack.c.bf16 %v820_v44, %v819_v14  ;;  %v2261_v44 = vld [vmem:[%s4605_s7 + $0xe0] sm:$0xff] }
 0x2e6   :  { %2778 = vmatmul.mubr.f32.vlgmr.msra.gmra.mrb[2].mxu0 %v671_v30  ;;  %3294 = vmatprep.subr.bf16.mxu1 %v3293_v32  ;;  %v821_v30 = vld [vmem:[#allocation2 + $0x150] sm:$0xff] }
 0x2e7   :  { %2847 = vmatprep.mubr.f32.mxu0 %v3774_v4  ;;  %3296 = vmatpush3.bf16.msra.mxu1 %v3293_v32  ;;  %v2260_v32 = vld [vmem:[%s4605_s7 + $0xd8] sm:$0xff] }
 0x2e8   :  { %3298 = vmatprep.subr.bf16.mxu1 %v3297_v45  ;;  %v3333_v14 = vpack.c.bf16 %v2260_v32, %v2259_v41  ;;  %v1248_v41 = vld [vmem:[#allocation2 + $0x180] sm:$0xff]  ;;  %v1249_v32 = vld [vmem:[#allocation2 + $0x188] sm:$0xff] }
 0x2eb   :  { %3300 = vmatpush3.bf16.msra.mxu1 %v3297_v45 }
 0x3b9   :  { %v2779_v31 = vpop.f32.mrb[2].mxu0 }
 0x3ba   :  { %v767_v47 = vadd.f32 %v2779_v31, %v694_v46  ;;  %v761_v29 = vpop.f32.mrb[3].mxu0 }
 0x3bb   :  { %v762_v8 = vadd.f32 %v761_v29, %v694_v46  ;;  %v822_v46 = vld [vmem:[#allocation2 + $0x158] sm:$0xff]  ;;  %v824_v29 = vld [vmem:[#allocation2 + $0x168] sm:$0xff] }
 0x3bc   :  { %772 = vadd.xlane.f32.xlu1 %v767_v47  ;;  %v3301_v31 = vpack.c.bf16 %v822_v46, %v821_v30  ;;  %v2262_v30 = vld [vmem:[%s4605_s7 + $0xe8] sm:$0xff]  ;;  %v2263_v46 = vld [vmem:[%s4605_s7 + $0xf0] sm:$0xff] }
 0x3bd   :  { %770 = vadd.xlane.f32.xlu0 %v762_v8  ;;  %v3337_v45 = vpack.c.bf16 %v2262_v30, %v2261_v44  ;;  %v3345_v44 = vpack.c.bf16 %v1249_v32, %v1248_v41  ;;  %v1251_v30 = vld [vmem:[#allocation2 + $0x198] sm:$0xff] }
 0x3be   :  { %3302 = vmatprep.subr.bf16.mxu1 %v3301_v31 }
 0x3bf   :  { %3304 = vmatpush3.bf16.msra.mxu1 %v3301_v31  ;;  %v2264_v31 = vld [vmem:[%s4605_s7 + $0xf8] sm:$0xff] }
 0x449   :  { %v773_v4 = vpop.xlane.xlu1 %772 }
 0x44a   :  { %v775_v54 = vmul.f32 0.03125, %v773_v4  ;;  %v771_v36 = vpop.xlane.xlu0 %770  ;;  %v3313_v4 = vpack.c.bf16 %v2250_v21, %v2249_v52 }
 0x44b   :  { %v774_v55 = vmul.f32 0.03125, %v771_v36 }
 0x44c   :  { %v777_v34 = vsub.f32 %v767_v47, %v775_v54  ;;  %v823_v47 = vld [vmem:[#allocation2 + $0x160] sm:$0xff]  ;;  %v2252_v54 = vld [vmem:[%s4605_s7 + $0x98] sm:$0xff]  ;;  %3314 = vmatprep.subr.bf16.mxu0 %v3313_v4 }
 0x44d   :  { %v776_v56 = vsub.f32 %v762_v8, %v774_v55  ;;  %v3305_v8 = vpack.c.bf16 %v824_v29, %v823_v47  ;;  %v3317_v36 = vpack.c.bf16 %v2252_v54, %v2251_v53  ;;  %v2253_v55 = vld [vmem:[%s4605_s7 + $0xa0] sm:$0xff]  ;;  %3316 = vmatpush3.bf16.msra.mxu0 %v3313_v4  ;;  %v3341_v47 = vpack.c.bf16 %v2264_v31, %v2263_v46  ;;  %v1253_v31 = vld [vmem:[#allocation2 + $0x1a8] sm:$0xff] }
 0x44e   :  { %v4053_v57 = vmul.f32 %v4045_v27, %v777_v34  ;;  %v2254_v34 = vld [vmem:[%s4605_s7 + $0xa8] sm:$0xff]  ;;  %v1252_v46 = vld [vmem:[#allocation2 + $0x1a0] sm:$0xff] }
 0x44f   :  { %v4048_v19 = vmul.f32 %v4045_v27, %v776_v56  ;;  %3306 = vmatprep.subr.bf16.mxu1 %v3305_v8  ;;  %3318 = vmatprep.subr.bf16.mxu0 %v3317_v36  ;;  %v3321_v56 = vpack.c.bf16 %v2254_v34, %v2253_v55 }
 0x450   :  { %v781_v13 = vmul.f32 %v4053_v57, %v4053_v57  ;;  %3308 = vmatpush3.bf16.msra.mxu1 %v3305_v8 }
 0x451   :  { %v780_v35 = vmul.f32 %v4048_v19, %v4048_v19  ;;  %3310 = vmatprep.subr.bf16.mxu1 %v3309_v49  ;;  %3320 = vmatpush3.bf16.msra.mxu0 %v3317_v36 }
 0x452   :  { %3322 = vmatprep.subr.bf16.mxu0 %v3321_v56 }
 0x453   :  { %782 = vadd.xlane.f32.xlu0 %v780_v35  ;;  %v2255_v35 = vld [vmem:[%s4605_s7 + $0xb0] sm:$0xff] }
 0x454   :  { %3312 = vmatpush3.bf16.msra.mxu1 %v3309_v49 }
 0x455   :  { %3324 = vmatpush3.bf16.msra.mxu0 %v3321_v56 }
 0x457   :  { %784 = vadd.xlane.f32.xlu0 %v781_v13  ;;  %v2256_v13 = vld [vmem:[%s4605_s7 + $0xb8] sm:$0xff] }
 0x458   :  { %v3325_v33 = vpack.c.bf16 %v2256_v13, %v2255_v35 }
 0x45a   :  { %3326 = vmatprep.subr.bf16.mxu0 %v3325_v33 }
 0x45b   :  { %3328 = vmatpush3.bf16.msra.mxu0 %v3325_v33 }
 0x45c   :  { %3330 = vmatprep.subr.bf16.mxu0 %v3329_v2 }
 0x45f   :  { %3332 = vmatpush3.bf16.msra.mxu0 %v3329_v2 }
 0x460   :  { %3334 = vmatprep.subr.bf16.mxu0 %v3333_v14 }
 0x463   :  { %3336 = vmatpush3.bf16.msra.mxu0 %v3333_v14  ;;  %v1250_v14 = vld [vmem:[#allocation2 + $0x190] sm:$0xff] }
 0x464   :  { %3338 = vmatprep.subr.bf16.mxu0 %v3337_v45 }
 0x467   :  { %3340 = vmatpush3.bf16.msra.mxu0 %v3337_v45  ;;  %v3349_v45 = vpack.c.bf16 %v1251_v30, %v1250_v14 }
 0x468   :  { %3342 = vmatprep.subr.bf16.mxu0 %v3341_v47 }
 0x46b   :  { %3344 = vmatpush3.bf16.msra.mxu0 %v3341_v47  ;;  %v3353_v47 = vpack.c.bf16 %v1253_v31, %v1252_v46 }
 0x46c   :  { %2889 = vmatprep.subr.bf16.mxu0 %v3592_v3 }
 0x46e   :  { %2848 = vmatmul.mubr.f32.vlgmr.msra.gmra.mrb[20].mxu0 %v3780_v5 }
 0x46f   :  { %2850 = vmatprep.mubr.f32.mxu0 %v3786_v6 }
 0x472   :  { %2851 = vmatmul.mubr.f32.gmra.mrb[22].mxu0 %v3791_v7 }
 0x473   :  { %2853 = vmatprep.mubr.f32.mxu0 %v3798_v9 }
 0x476   :  { %2854 = vmatmul.mubr.f32.gmra.mrb[24].mxu0 %v3803_v10 }
 0x477   :  { %2856 = vmatprep.mubr.f32.mxu0 %v3808_v11 }
 0x47a   :  { %2857 = vmatmul.mubr.f32.gmra.mrb[26].mxu0 %v3816_v12  ;;  %v4124_v12 = vsub.s32 2, %v3963_v37 }
 0x47b   :  { %2859 = vmatprep.mubr.f32.mxu0 %v3826_v15  ;;  %v4127_v15 = vsub.s32 3, %v3963_v37 }
 0x47e   :  { %2860 = vmatmul.mubr.f32.gmra.mrb[28].mxu0 %v3831_v16  ;;  %v797_v16 = vrot.slane %v3971_v39, %v4124_v12 }
 0x47f   :  { %2862 = vmatprep.mubr.f32.mxu0 %v3836_v17 }
 0x482   :  { %2863 = vmatmul.mubr.f32.gmra.mrb[30].mxu0 %v3845_v20 }
 0x483   :  { %2865 = vmatprep.mubr.f32.mxu0 %v3857_v23  ;;  %v803_v23 = vrot.slane %v3971_v39, %v4127_v15 }
 0x486   :  { %2866 = vmatmul.mubr.f32.gmra.mrb[32].mxu0 %v3862_v24 }
 0x487   :  { %2868 = vmatprep.mubr.f32.mxu0 %v3867_v25 }
 0x48a   :  { %2869 = vmatmul.mubr.f32.gmra.mrb[34].mxu0 %v3875_v26 }
 0x48b   :  { %2905 = vmatprep.mubr.msk.bf16.mxu0 %vm3593_vm1, %v3592_v3 }
 0x4e0   :  { %v783_v5 = vpop.xlane.xlu0 %782 }
 0x4e1   :  { %v786_v6 = vmul.f32 0.03125, %v783_v5  ;;  %v1254_v5 = vld [vmem:[#allocation2 + $0x1b0] sm:$0xff] }
 0x4e3   :  { %v788_v7 = vadd.f32 1e-05, %v786_v6  ;;  %v1255_v6 = vld [vmem:[#allocation2 + $0x1b8] sm:$0xff] }
 0x4e4   :  { %v785_v9 = vpop.xlane.xlu0 %784 }
 0x4e5   :  { %3534 = vrsqrt.f32 %v788_v7  ;;  %v787_v10 = vmul.f32 0.03125, %v785_v9  ;;  %v3357_v7 = vpack.c.bf16 %v1255_v6, %v1254_v5  ;;  %v1256_v9 = vld [vmem:[#allocation2 + $0x1c0] sm:$0xff] }
 0x4e7   :  { %v789_v11 = vadd.f32 1e-05, %v787_v10  ;;  %v1257_v10 = vld [vmem:[#allocation2 + $0x1c8] sm:$0xff] }
 0x4e9   :  { %3536 = vrsqrt.f32 %v789_v11  ;;  %v3361_v11 = vpack.c.bf16 %v1257_v10, %v1256_v9 }
 0x4ef   :  { %v3535_v17 = vpop.eup %3534 }
 0x4f0   :  { %v792_v20 = vmul.f32 %v3535_v17, %v4048_v19  ;;  %v1259_v17 = vld [vmem:[#allocation2 + $0x1d8] sm:$0xff] }
 0x4f2   :  { %v798_v24 = vmul.f32 %v797_v16, %v792_v20 }
 0x4f3   :  { %v3537_v25 = vpop.eup %3536 }
 0x4f4   :  { %v804_v26 = vadd.f32 %v803_v23, %v798_v24  ;;  %v793_v29 = vmul.f32 %v3537_v25, %v4053_v57  ;;  %v1261_v24 = vld [vmem:[#allocation2 + $0x1e8] sm:$0xff] }
 0x4f6   :  { %v806_v8 = vmax.f32 %v804_v26, 0.0  ;;  %v799_v48 = vmul.f32 %v797_v16, %v793_v29  ;;  %v1258_v16 = vld [vmem:[#allocation2 + $0x1d0] sm:$0xff]  ;;  %v4186_v26 = vld [vmem:[%s4606_s8 + $0x8] sm:$0xff] }
 0x4f7   :  { %v3365_v20 = vpack.c.bf16 %v1259_v17, %v1258_v16  ;;  %v4190_v29 = vrot.slane %v4186_v26, %v3966_v38 }
 0x4f8   :  { %2812 = vmatprep.mubr.f32.mxu1 %v806_v8  ;;  %v805_v28 = vadd.f32 %v803_v23, %v799_v48  ;;  %v1260_v23 = vld [vmem:[#allocation2 + $0x1e0] sm:$0xff] }
 0x4f9   :  { %v3369_v25 = vpack.c.bf16 %v1261_v24, %v1260_v23 }
 0x4fa   :  { %v807_v37 = vmax.f32 %v805_v28, 0.0 }
 0x4fc   :  { %2813 = vmatmul.mubr.f32.vlgmr.msra.gmra.mrb[20].mxu1 %v807_v37 }
 0x4fd   :  { %2873 = vmatprep.mubr.msk.bf16.mxu1 %vm467_vm2, %v3849_v22 }
 0x541   :  { %v4137_v49 = vpop.f32.mrb[20].mxu0 }
 0x542   :  { %v4139_v19 = vpop.f32.mrb[21].mxu0 }
 0x545   :  { %v4141_v52 = vpop.f32.mrb[22].mxu0 }
 0x546   :  { %v4143_v39 = vpop.f32.mrb[23].mxu0 }
 0x549   :  { %v4159_v4 = vpop.f32.mrb[24].mxu0 }
 0x54a   :  { %v4161_v54 = vpop.f32.mrb[25].mxu0 }
 0x54d   :  { %v4163_v36 = vpop.f32.mrb[26].mxu0 }
 0x54e   :  { %v4165_v55 = vpop.f32.mrb[27].mxu0 }
 0x551   :  { %v4167_v34 = vpop.f32.mrb[28].mxu0 }
 0x552   :  { %v4169_v56 = vpop.f32.mrb[29].mxu0 }
 0x555   :  { %v4171_v35 = vpop.f32.mrb[30].mxu0 }
 0x556   :  { %v4173_v13 = vpop.f32.mrb[31].mxu0 }
 0x559   :  { %v4175_v33 = vpop.f32.mrb[32].mxu0 }
 0x55a   :  { %v4177_v59 = vpop.f32.mrb[33].mxu0 }
 0x55d   :  { %v4179_v18 = vpop.f32.mrb[34].mxu0 }
 0x55e   :  { %v4181_v2 = vpop.f32.mrb[35].mxu0 }
 0x5cf   :  { %v2814_v21 = vpop.f32.mrb[20].mxu1 }
 0x5d0   :  { %v893_v53 = vpop.f32.mrb[21].mxu1 }
 0x5d1   :  { %v902_v57 = vpack.c.bf16 %v2814_v21, %v893_v53 }
 0x5d3   :  { %2871 = vmatprep.subr.bf16.mxu1 %v902_v57 }
 0x5d4   :  { %2872 = vmatpush3.bf16.msra.mxu1 %v902_v57 }
 0x5d5   :  { %3346 = vmatprep.subr.bf16.mxu1 %v3345_v44 }
 0x5d7   :  { %2874 = vmatmul.mubr.msk.bf16.vlgmr.msra.gmra.mrb[24].mxu1 %vm467_vm2, %v3886_v42 }
 0x5d8   :  { %2877 = vmatprep.mubr.msk.bf16.mxu1 %vm467_vm2, %v3888_v43  ;;  %3348 = vmatpush3.bf16.msra.mxu1 %v3345_v44 }
 0x5d9   :  { %3350 = vmatprep.subr.bf16.mxu1 %v3349_v45 }
 0x5dc   :  { %3352 = vmatpush3.bf16.msra.mxu1 %v3349_v45 }
 0x5dd   :  { %3354 = vmatprep.subr.bf16.mxu1 %v3353_v47 }
 0x5df   :  { %2878 = vmatmul.mubr.msk.bf16.gmra.mrb[28].mxu1 %vm467_vm2, %v3902_v50 }
 0x5e0   :  { %2881 = vmatprep.mubr.msk.bf16.mxu1 %vm467_vm2, %v3904_v51  ;;  %3356 = vmatpush3.bf16.msra.mxu1 %v3353_v47 }
 0x5e1   :  { %3358 = vmatprep.subr.bf16.mxu1 %v3357_v7 }
 0x5e4   :  { %3360 = vmatpush3.bf16.msra.mxu1 %v3357_v7 }
 0x5e5   :  { %3362 = vmatprep.subr.bf16.mxu1 %v3361_v11 }
 0x5e7   :  { %2882 = vmatmul.mubr.msk.bf16.gmra.mrb[32].mxu1 %vm467_vm2, %v3918_v60 }
 0x5e8   :  { %2885 = vmatprep.mubr.msk.bf16.mxu1 %vm467_vm2, %v3920_v61  ;;  %3364 = vmatpush3.bf16.msra.mxu1 %v3361_v11 }
 0x5e9   :  { %3366 = vmatprep.subr.bf16.mxu1 %v3365_v20 }
 0x5ec   :  { %3368 = vmatpush3.bf16.msra.mxu1 %v3365_v20 }
 0x5ed   :  { %3370 = vmatprep.subr.bf16.mxu1 %v3369_v25 }
 0x5ef   :  { %2886 = vmatmul.mubr.msk.bf16.gmra.mrb[36].mxu1 %vm467_vm2, %v3930_v0 }
 0x5f0   :  { %3372 = vmatpush3.bf16.msra.mxu1 %v3369_v25 }
 0x6aa   :  { %v2875_v8 = vpop.f32.mrb[24].mxu1 }
 0x6ab   :  { %v1108_v48 = vadd.f32 %v2875_v8, %v4143_v39  ;;  %v1099_v28 = vpop.f32.mrb[25].mxu1 }
 0x6ac   :  { %v1100_v37 = vadd.f32 %v1099_v28, %v4139_v19  ;;  %v2876_v21 = vpop.f32.mrb[26].mxu1 }
 0x6ad   :  { %v1168_v53 = vadd.f32 %v4190_v29, %v1108_v48  ;;  %v1111_v57 = vadd.f32 %v2876_v21, %v4141_v52  ;;  %v1102_v41 = vpop.f32.mrb[27].mxu1 }
 0x6ae   :  { %v1166_v32 = vadd.f32 %v4190_v29, %v1100_v37  ;;  %v1103_v14 = vadd.f32 %v4137_v49, %v1102_v41 }
 0x6af   :  { %v1169_v44 = vadd.f32 %v4190_v29, %v1111_v57  ;;  %v1184_v45 = vmax.f32 %v1168_v53, 0.0 }
 0x6b0   :  { %v1167_v30 = vadd.f32 %v4190_v29, %v1103_v14  ;;  %v1182_v39 = vmax.f32 %v1166_v32, 0.0 }
 0x6b1   :  { %v1185_v46 = vmax.f32 %v1169_v44, 0.0 }
 0x6b2   :  { %v1183_v31 = vmax.f32 %v1167_v30, 0.0  ;;  %v2879_v47 = vpop.f32.mrb[28].mxu1 }
 0x6b3   :  { %v1199_v19 = vpack.c.bf16 %v1185_v46, %v1184_v45  ;;  %v1124_v5 = vadd.f32 %v2879_v47, %v4165_v55  ;;  %v1115_v6 = vpop.f32.mrb[29].mxu1 }
 0x6b4   :  { %v1198_v7 = vpack.c.bf16 %v1183_v31, %v1182_v39  ;;  %v1116_v52 = vadd.f32 %v1115_v6, %v4161_v54  ;;  %v2880_v9 = vpop.f32.mrb[30].mxu1 }
 0x6b5   :  { %v1172_v10 = vadd.f32 %v4190_v29, %v1124_v5  ;;  %v1127_v49 = vadd.f32 %v2880_v9, %v4163_v36  ;;  %v1118_v11 = vpop.f32.mrb[31].mxu1 }
 0x6b6   :  { %v1170_v16 = vadd.f32 %v4190_v29, %v1116_v52  ;;  %v1119_v17 = vadd.f32 %v4159_v4, %v1118_v11  ;;  %2890 = vmatpush3.bf16.msra.mxu0 %v1198_v7 }
 0x6b7   :  { %v1173_v20 = vadd.f32 %v4190_v29, %v1127_v49  ;;  %2891 = vmatprep.subr.bf16.mxu0 %v3592_v3  ;;  %v1188_v23 = vmax.f32 %v1172_v10, 0.0 }
 0x6b8   :  { %v1171_v55 = vadd.f32 %v4190_v29, %v1119_v17  ;;  %v1186_v54 = vmax.f32 %v1170_v16, 0.0 }
 0x6b9   :  { %v1189_v24 = vmax.f32 %v1173_v20, 0.0 }
 0x6ba   :  { %v1187_v25 = vmax.f32 %v1171_v55, 0.0  ;;  %v2883_v8 = vpop.f32.mrb[32].mxu1  ;;  %2892 = vmatpush3.bf16.msra.mxu0 %v1199_v19  ;;  %v1263_v55 = vld [vmem:[#allocation2 + $0x1f8] sm:$0xff] }
 0x6bb   :  { %v1201_v48 = vpack.c.bf16 %v1189_v24, %v1188_v23  ;;  %v1140_v36 = vadd.f32 %v2883_v8, %v4173_v13  ;;  %v1131_v28 = vpop.f32.mrb[33].mxu1  ;;  %2893 = vmatprep.subr.bf16.mxu0 %v3592_v3 }
 0x6bc   :  { %v1200_v4 = vpack.c.bf16 %v1187_v25, %v1186_v54  ;;  %v1132_v37 = vadd.f32 %v1131_v28, %v4169_v56  ;;  %v2884_v21 = vpop.f32.mrb[34].mxu1  ;;  %v1267_v28 = vrot.slane %v4186_v26, %v4039_v1 }
 0x6bd   :  { %v1176_v53 = vadd.f32 %v4190_v29, %v1140_v36  ;;  %v1143_v57 = vadd.f32 %v2884_v21, %v4171_v35  ;;  %v1134_v41 = vpop.f32.mrb[35].mxu1  ;;  %v3546_v36 = vld [vmem:[%s4601_s3] sm:$0xff] }
 0x6be   :  { %v1174_v32 = vadd.f32 %v4190_v29, %v1132_v37  ;;  %v1135_v14 = vadd.f32 %v4167_v34, %v1134_v41  ;;  %2894 = vmatpush3.bf16.msra.mxu0 %v1200_v4 }
 0x6bf   :  { %v1177_v44 = vadd.f32 %v4190_v29, %v1143_v57  ;;  %2895 = vmatprep.subr.bf16.mxu0 %v3592_v3  ;;  %v1192_v30 = vmax.f32 %v1176_v53, 0.0  ;;  %v1385_v57 = vld [vmem:[#allocation2 + $0x208] sm:$0xff] }
 0x6c0   :  { %v1175_v13 = vadd.f32 %v4190_v29, %v1135_v14  ;;  %v1190_v56 = vmax.f32 %v1174_v32, 0.0  ;;  %v1387_v32 = vld [vmem:[#allocation2 + $0x218] sm:$0xff] }
 0x6c1   :  { %v1193_v45 = vmax.f32 %v1177_v44, 0.0 }
 0x6c2   :  { %v1191_v46 = vmax.f32 %v1175_v13, 0.0  ;;  %v2887_v39 = vpop.f32.mrb[36].mxu1  ;;  %2896 = vmatpush3.bf16.msra.mxu0 %v1201_v48 }
 0x6c3   :  { %v1203_v31 = vpack.c.bf16 %v1193_v45, %v1192_v30  ;;  %v1156_v35 = vadd.f32 %v2887_v39, %v4181_v2  ;;  %v1147_v47 = vpop.f32.mrb[37].mxu1  ;;  %2897 = vmatprep.subr.bf16.mxu0 %v3592_v3 }
 0x6c4   :  { %v1202_v34 = vpack.c.bf16 %v1191_v46, %v1190_v56  ;;  %v1148_v19 = vadd.f32 %v1147_v47, %v4177_v59  ;;  %v2888_v5 = vpop.f32.mrb[38].mxu1 }
 0x6c5   :  { %v1180_v6 = vadd.f32 %v4190_v29, %v1156_v35  ;;  %v1159_v7 = vadd.f32 %v2888_v5, %v4179_v18  ;;  %v1150_v52 = vpop.f32.mrb[39].mxu1 }
 0x6c6   :  { %v1178_v9 = vadd.f32 %v4190_v29, %v1148_v19  ;;  %v1151_v10 = vadd.f32 %v4175_v33, %v1150_v52  ;;  %2898 = vmatpush3.bf16.msra.mxu0 %v1202_v34  ;;  %v1262_v33 = vld [vmem:[#allocation2 + $0x1f0] sm:$0xff]  ;;  %v1388_v34 = vld [vmem:[#allocation2 + $0x220] sm:$0xff]  ;;  %v1389_v19 = vld [vmem:[#allocation2 + $0x228] sm:$0xff] }
 0x6c7   :  { %v1181_v49 = vadd.f32 %v4190_v29, %v1159_v7  ;;  %2899 = vmatprep.subr.bf16.mxu0 %v3592_v3  ;;  %v1196_v11 = vmax.f32 %v1180_v6, 0.0  ;;  %v3385_v5 = vpack.c.bf16 %v1389_v19, %v1388_v34  ;;  %v1390_v6 = vld [vmem:[#allocation2 + $0x230] sm:$0xff]  ;;  %v1391_v7 = vld [vmem:[#allocation2 + $0x238] sm:$0xff]  ;;  %v3550_v34 = vld [vmem:[%s4601_s3 + $0x20] sm:$0xff] }
 0x6c8   :  { %v1179_v2 = vadd.f32 %v4190_v29, %v1151_v10  ;;  %v1194_v59 = vmax.f32 %v1178_v9, 0.0  ;;  %v3373_v29 = vpack.c.bf16 %v1263_v55, %v1262_v33  ;;  %v3389_v52 = vpack.c.bf16 %v1391_v7, %v1390_v6  ;;  %v1392_v9 = vld [vmem:[#allocation2 + $0x240] sm:$0xff]  ;;  %v1393_v10 = vld [vmem:[#allocation2 + $0x248] sm:$0xff]  ;;  %v1399_v33 = vld [vmem:[#allocation2 + $0x278] sm:$0xff] }
 0x6c9   :  { %v1197_v16 = vmax.f32 %v1181_v49, 0.0  ;;  %v1394_v49 = vld [vmem:[#allocation2 + $0x250] sm:$0xff]  ;;  %v3551_v19 = vld [vmem:[%s4601_s3 + $0x28] sm:$0xff]  ;;  %v3553_v6 = vld [vmem:[%s4601_s3 + $0x38] sm:$0xff] }
 0x6ca   :  { %v1195_v17 = vmax.f32 %v1179_v2, 0.0  ;;  %2900 = vmatpush3.bf16.msra.mxu0 %v1203_v31  ;;  %3374 = vmatprep.subr.bf16.mxu1 %v3373_v29  ;;  %v3393_v2 = vpack.c.bf16 %v1393_v10, %v1392_v9  ;;  %v3554_v7 = vld [vmem:[%s4601_s3 + $0x40] sm:$0xff]  ;;  %v3556_v9 = vld [vmem:[%s4601_s3 + $0x50] sm:$0xff]  ;;  %v3557_v10 = vld [vmem:[%s4601_s3 + $0x58] sm:$0xff] }
 0x6cb   :  { %v1205_v20 = vpack.c.bf16 %v1197_v16, %v1196_v11  ;;  %2901 = vmatprep.subr.bf16.mxu0 %v3592_v3  ;;  %3376 = vmatpush3.bf16.msra.mxu1 %v3373_v29  ;;  %v1395_v11 = vld [vmem:[#allocation2 + $0x258] sm:$0xff]  ;;  %v2276_v29 = vld [vmem:[%s4605_s7 + $0x100] sm:$0xff] }
 0x6cc   :  { %v1204_v18 = vpack.c.bf16 %v1195_v17, %v1194_v59  ;;  %v3397_v16 = vpack.c.bf16 %v1395_v11, %v1394_v49  ;;  %v1396_v59 = vld [vmem:[#allocation2 + $0x260] sm:$0xff]  ;;  %v1397_v17 = vld [vmem:[#allocation2 + $0x268] sm:$0xff]  ;;  %v3560_v11 = vld [vmem:[%s4601_s3 + $0x70] sm:$0xff] }
 0x6cd   :  { %v3558_v49 = vld [vmem:[%s4601_s3 + $0x60] sm:$0xff] }
 0x6ce   :  { %2902 = vmatpush3.bf16.msra.mxu0 %v1204_v18  ;;  %v1398_v18 = vld [vmem:[#allocation2 + $0x270] sm:$0xff] }
 0x6cf   :  { %2903 = vmatprep.subr.bf16.mxu0 %v3592_v3  ;;  %v3405_v55 = vpack.c.bf16 %v1399_v33, %v1398_v18 }
 0x6d2   :  { %2904 = vmatpush3.bf16.msra.mxu0 %v1205_v20  ;;  %v3401_v20 = vpack.c.bf16 %v1397_v17, %v1396_v59 }
 0x6d5   :  { %2906 = vmatmul.mubr.msk.bf16.vlgmr.msra.gmra.mrb[36].mxu0 %vm4018_vm5, %v3594_v58 }
 0x7a8   :  { %v1240_v23 = vpop.f32.mrb[36].mxu0 }
 0x7a9   :  { %v1241_v24 = vadd.f32 %v1240_v23, %v4028_v63  ;;  %v2907_v54 = vpop.f32.mrb[37].mxu0  ;;  %v1384_v63 = vld [vmem:[#allocation2 + $0x200] sm:$0xff]  ;;  %v2277_v23 = vld [vmem:[%s4605_s7 + $0x108] sm:$0xff] }
 0x7aa   :  { %v1243_v25 = vpop.f32.mrb[38].mxu0  ;;  %v3377_v41 = vpack.c.bf16 %v1385_v57, %v1384_v63  ;;  %v3409_v54 = vpack.c.bf16 %v2277_v23, %v2276_v29  ;;  %v2285_v63 = vld [vmem:[%s4605_s7 + $0x148] sm:$0xff]  ;;  %v1370_v29 = vrot.slane %v4186_v26, %v4124_v12 }
 0x7ab   :  { %v1244_v8 = vadd.f32 %v1243_v25, %v4033_v62  ;;  %v2908_v48 = vpop.f32.mrb[39].mxu0  ;;  %2941 = vmatprep.mubr.f32.mxu1 %v1241_v24  ;;  %v1386_v62 = vld [vmem:[#allocation2 + $0x210] sm:$0xff]  ;;  %v2279_v25 = vld [vmem:[%s4605_s7 + $0x118] sm:$0xff] }
 0x7ac   :  { %v3381_v14 = vpack.c.bf16 %v1387_v32, %v1386_v62  ;;  %3378 = vmatprep.subr.bf16.mxu0 %v3377_v41  ;;  %v2278_v24 = vld [vmem:[%s4605_s7 + $0x110] sm:$0xff]  ;;  %v2280_v48 = vld [vmem:[%s4605_s7 + $0x120] sm:$0xff]  ;;  %3410 = vmatprep.subr.bf16.mxu1 %v3409_v54 }
 0x7ad   :  { %2942 = vmatmul.mubr.f32.vlgmr.msra.gmra.mrb[22].mxu1 %v1244_v8  ;;  %3380 = vmatpush3.bf16.msra.mxu0 %v3377_v41  ;;  %v3413_v8 = vpack.c.bf16 %v2279_v25, %v2278_v24  ;;  %v2286_v62 = vld [vmem:[%s4605_s7 + $0x150] sm:$0xff]  ;;  %v2287_v41 = vld [vmem:[%s4605_s7 + $0x158] sm:$0xff] }
 0x7ae   :  { %3011 = vmatprep.mubr.f32.mxu1 %v3546_v36  ;;  %3382 = vmatprep.subr.bf16.mxu0 %v3381_v14  ;;  %v2281_v36 = vld [vmem:[%s4605_s7 + $0x128] sm:$0xff]  ;;  %v3429_v32 = vpack.c.bf16 %v2287_v41, %v2286_v62 }
 0x7af   :  { %3412 = vmatpush3.bf16.msra.mxu1 %v3409_v54  ;;  %v1376_v54 = vrot.slane %v4186_v26, %v4127_v15 }
 0x7b0   :  { %3414 = vmatprep.subr.bf16.mxu1 %v3413_v8 }
 0x7b1   :  { %3384 = vmatpush3.bf16.msra.mxu0 %v3381_v14  ;;  %v2288_v14 = vld [vmem:[%s4605_s7 + $0x160] sm:$0xff] }
 0x7b2   :  { %3386 = vmatprep.subr.bf16.mxu0 %v3385_v5 }
 0x7b3   :  { %3416 = vmatpush3.bf16.msra.mxu1 %v3413_v8 }
 0x7b5   :  { %3388 = vmatpush3.bf16.msra.mxu0 %v3385_v5  ;;  %v3552_v5 = vld [vmem:[%s4601_s3 + $0x30] sm:$0xff] }
 0x7b6   :  { %3390 = vmatprep.subr.bf16.mxu0 %v3389_v52 }
 0x7b9   :  { %3392 = vmatpush3.bf16.msra.mxu0 %v3389_v52  ;;  %v3555_v52 = vld [vmem:[%s4601_s3 + $0x48] sm:$0xff] }
 0x7ba   :  { %3394 = vmatprep.subr.bf16.mxu0 %v3393_v2 }
 0x7bd   :  { %3396 = vmatpush3.bf16.msra.mxu0 %v3393_v2  ;;  %v3559_v2 = vld [vmem:[%s4601_s3 + $0x68] sm:$0xff] }
 0x7be   :  { %3398 = vmatprep.subr.bf16.mxu0 %v3397_v16 }
 0x7c1   :  { %3400 = vmatpush3.bf16.msra.mxu0 %v3397_v16  ;;  %v3561_v16 = vld [vmem:[%s4601_s3 + $0x78] sm:$0xff] }
 0x7c2   :  { %3402 = vmatprep.subr.bf16.mxu0 %v3401_v20 }
 0x7c5   :  { %3404 = vmatpush3.bf16.msra.mxu0 %v3401_v20 }
 0x7c6   :  { %3406 = vmatprep.subr.bf16.mxu0 %v3405_v55 }
 0x7c9   :  { %3408 = vmatpush3.bf16.msra.mxu0 %v3405_v55 }
 0x880   :  { %v2943_v4 = vpop.f32.mrb[22].mxu1 }
 0x881   :  { %v1340_v37 = vadd.f32 %v2943_v4, %v1267_v28  ;;  %v1334_v21 = vpop.f32.mrb[23].mxu1  ;;  %v2282_v4 = vld [vmem:[%s4605_s7 + $0x130] sm:$0xff] }
 0x882   :  { %v1335_v53 = vadd.f32 %v1334_v21, %v1267_v28  ;;  %v3417_v28 = vpack.c.bf16 %v2281_v36, %v2280_v48 }
 0x883   :  { %1345 = vadd.xlane.f32.xlu0 %v1340_v37 }
 0x884   :  { %1343 = vadd.xlane.f32.xlu1 %v1335_v53  ;;  %3418 = vmatprep.subr.bf16.mxu1 %v3417_v28 }
 0x885   :  { %3420 = vmatpush3.bf16.msra.mxu1 %v3417_v28 }
 0x910   :  { %v1346_v44 = vpop.xlane.xlu0 %1345 }
 0x911   :  { %v1348_v13 = vmul.f32 0.03125, %v1346_v44  ;;  %v1344_v30 = vpop.xlane.xlu1 %1343  ;;  %v2289_v44 = vld [vmem:[%s4605_s7 + $0x168] sm:$0xff] }
 0x912   :  { %v1347_v45 = vmul.f32 0.03125, %v1344_v30  ;;  %v2290_v30 = vld [vmem:[%s4605_s7 + $0x170] sm:$0xff] }
 0x913   :  { %v1350_v56 = vsub.f32 %v1340_v37, %v1348_v13  ;;  %v2283_v37 = vld [vmem:[%s4605_s7 + $0x138] sm:$0xff]  ;;  %v3433_v13 = vpack.c.bf16 %v2289_v44, %v2288_v14 }
 0x914   :  { %v1349_v46 = vsub.f32 %v1335_v53, %v1347_v45  ;;  %v3421_v21 = vpack.c.bf16 %v2283_v37, %v2282_v4  ;;  %v2284_v53 = vld [vmem:[%s4605_s7 + $0x140] sm:$0xff]  ;;  %v2291_v45 = vld [vmem:[%s4605_s7 + $0x178] sm:$0xff] }
 0x915   :  { %v4242_v39 = vmul.f32 %v4045_v27, %v1350_v56  ;;  %v3425_v57 = vpack.c.bf16 %v2285_v63, %v2284_v53  ;;  %v3437_v56 = vpack.c.bf16 %v2291_v45, %v2290_v30  ;;  %v1822_v30 = vld [vmem:[#allocation2 + $0x288] sm:$0xff]  ;;  %v1823_v45 = vld [vmem:[#allocation2 + $0x290] sm:$0xff] }
 0x916   :  { %v4245_v31 = vmul.f32 %v4045_v27, %v1349_v46  ;;  %3422 = vmatprep.subr.bf16.mxu1 %v3421_v21  ;;  %v3547_v46 = vld [vmem:[%s4601_s3 + $0x8] sm:$0xff] }
 0x917   :  { %v1354_v35 = vmul.f32 %v4242_v39, %v4242_v39  ;;  %3424 = vmatpush3.bf16.msra.mxu1 %v3421_v21 }
 0x918   :  { %v1353_v47 = vmul.f32 %v4245_v31, %v4245_v31  ;;  %3426 = vmatprep.subr.bf16.mxu1 %v3425_v57 }
 0x919   :  { %1357 = vadd.xlane.f32.xlu0 %v1354_v35  ;;  %v3548_v35 = vld [vmem:[%s4601_s3 + $0x10] sm:$0xff] }
 0x91a   :  { %1355 = vadd.xlane.f32.xlu1 %v1353_v47  ;;  %v3549_v47 = vld [vmem:[%s4601_s3 + $0x18] sm:$0xff] }
 0x91b   :  { %3428 = vmatpush3.bf16.msra.mxu1 %v3425_v57 }
 0x91c   :  { %3430 = vmatprep.subr.bf16.mxu1 %v3429_v32 }
 0x91f   :  { %3432 = vmatpush3.bf16.msra.mxu1 %v3429_v32 }
 0x920   :  { %3434 = vmatprep.subr.bf16.mxu1 %v3433_v13 }
 0x923   :  { %3436 = vmatpush3.bf16.msra.mxu1 %v3433_v13  ;;  %v1821_v13 = vld [vmem:[#allocation2 + $0x280] sm:$0xff] }
 0x924   :  { %3438 = vmatprep.subr.bf16.mxu1 %v3437_v56 }
 0x927   :  { %3440 = vmatpush3.bf16.msra.mxu1 %v3437_v56  ;;  %v3441_v56 = vpack.c.bf16 %v1822_v30, %v1821_v13 }
 0x928   :  { %3053 = vmatprep.subr.bf16.mxu1 %v3592_v3 }
 0x92a   :  { %3012 = vmatmul.mubr.f32.vlgmr.msra.gmra.mrb[40].mxu1 %v3547_v46  ;;  %v1824_v46 = vld [vmem:[#allocation2 + $0x298] sm:$0xff] }
 0x92b   :  { %3014 = vmatprep.mubr.f32.mxu1 %v3548_v35  ;;  %v3445_v35 = vpack.c.bf16 %v1824_v46, %v1823_v45 }
 0x92e   :  { %3015 = vmatmul.mubr.f32.gmra.mrb[42].mxu1 %v3549_v47  ;;  %v1825_v47 = vld [vmem:[#allocation2 + $0x2a0] sm:$0xff] }
 0x92f   :  { %3017 = vmatprep.mubr.f32.mxu1 %v3550_v34  ;;  %v1826_v34 = vld [vmem:[#allocation2 + $0x2a8] sm:$0xff] }
 0x932   :  { %3018 = vmatmul.mubr.f32.gmra.mrb[44].mxu1 %v3551_v19  ;;  %v3449_v19 = vpack.c.bf16 %v1826_v34, %v1825_v47 }
 0x933   :  { %3020 = vmatprep.mubr.f32.mxu1 %v3552_v5  ;;  %v1827_v5 = vld [vmem:[#allocation2 + $0x2b0] sm:$0xff] }
 0x936   :  { %3021 = vmatmul.mubr.f32.gmra.mrb[46].mxu1 %v3553_v6  ;;  %v1828_v6 = vld [vmem:[#allocation2 + $0x2b8] sm:$0xff] }
 0x937   :  { %3023 = vmatprep.mubr.f32.mxu1 %v3554_v7  ;;  %v3453_v7 = vpack.c.bf16 %v1828_v6, %v1827_v5 }
 0x93a   :  { %3024 = vmatmul.mubr.f32.gmra.mrb[48].mxu1 %v3555_v52  ;;  %v1829_v52 = vld [vmem:[#allocation2 + $0x2c0] sm:$0xff] }
 0x93b   :  { %3026 = vmatprep.mubr.f32.mxu1 %v3556_v9  ;;  %v1830_v9 = vld [vmem:[#allocation2 + $0x2c8] sm:$0xff] }
 0x93e   :  { %3027 = vmatmul.mubr.f32.gmra.mrb[50].mxu1 %v3557_v10  ;;  %v3457_v10 = vpack.c.bf16 %v1830_v9, %v1829_v52 }
 0x93f   :  { %3029 = vmatprep.mubr.f32.mxu1 %v3558_v49  ;;  %v1831_v49 = vld [vmem:[#allocation2 + $0x2d0] sm:$0xff] }
 0x942   :  { %3030 = vmatmul.mubr.f32.gmra.mrb[52].mxu1 %v3559_v2  ;;  %v1832_v2 = vld [vmem:[#allocation2 + $0x2d8] sm:$0xff] }
 0x943   :  { %3032 = vmatprep.mubr.f32.mxu1 %v3560_v11  ;;  %v3461_v11 = vpack.c.bf16 %v1832_v2, %v1831_v49 }
 0x946   :  { %3033 = vmatmul.mubr.f32.gmra.mrb[54].mxu1 %v3561_v16  ;;  %v1833_v16 = vld [vmem:[#allocation2 + $0x2e0] sm:$0xff] }
 0x947   :  { %3069 = vmatprep.mubr.msk.bf16.mxu1 %vm3593_vm1, %v3592_v3 }
 0x9a6   :  { %v1358_v59 = vpop.xlane.xlu0 %1357 }
 0x9a7   :  { %v1360_v17 = vmul.f32 0.03125, %v1358_v59  ;;  %v1356_v20 = vpop.xlane.xlu1 %1355  ;;  %v1834_v59 = vld [vmem:[#allocation2 + $0x2e8] sm:$0xff] }
 0x9a8   :  { %v1359_v18 = vmul.f32 0.03125, %v1356_v20  ;;  %v4404_v20 = vld [vmem:[%s4606_s8 + $0x10] sm:$0xff] }
 0x9a9   :  { %v1362_v33 = vadd.f32 1e-05, %v1360_v17  ;;  %v3465_v17 = vpack.c.bf16 %v1834_v59, %v1833_v16 }
 0x9aa   :  { %v1361_v55 = vadd.f32 1e-05, %v1359_v18  ;;  %v4408_v18 = vrot.slane %v4404_v20, %v3966_v38 }
 0x9ab   :  { %3538 = vrsqrt.f32 %v1362_v33 }
 0x9ac   :  { %3540 = vrsqrt.f32 %v1361_v55 }
 0x9b5   :  { %v3539_v23 = vpop.eup %3538 }
 0x9b6   :  { %v3541_v24 = vpop.eup %3540  ;;  %v1366_v25 = vmul.f32 %v3539_v23, %v4242_v39 }
 0x9b7   :  { %v1365_v8 = vmul.f32 %v3541_v24, %v4245_v31 }
 0x9b8   :  { %v1372_v48 = vmul.f32 %v1370_v29, %v1366_v25 }
 0x9b9   :  { %v1371_v36 = vmul.f32 %v1370_v29, %v1365_v8 }
 0x9ba   :  { %v1378_v28 = vadd.f32 %v1376_v54, %v1372_v48 }
 0x9bb   :  { %v1377_v4 = vadd.f32 %v1376_v54, %v1371_v36 }
 0x9bc   :  { %v1380_v21 = vmax.f32 %v1378_v28, 0.0 }
 0x9bd   :  { %v1379_v37 = vmax.f32 %v1377_v4, 0.0 }
 0x9bf   :  { %2976 = vmatprep.mubr.f32.mxu0 %v1379_v37 }
 0x9c0   :  { %2977 = vmatmul.mubr.f32.vlgmr.msra.gmra.mrb[40].mxu0 %v1380_v21 }
 0x9c1   :  { %3037 = vmatprep.mubr.msk.bf16.mxu0 %vm467_vm2, %v3849_v22 }
 0x9fd   :  { %v4355_v53 = vpop.f32.mrb[40].mxu1 }
 0x9fe   :  { %v4357_v63 = vpop.f32.mrb[41].mxu1 }
 0xa01   :  { %v4359_v26 = vpop.f32.mrb[42].mxu1 }
 0xa02   :  { %v4361_v39 = vpop.f32.mrb[43].mxu1 }
 0xa05   :  { %v4377_v22 = vpop.f32.mrb[44].mxu1 }
 0xa93   :  { %v2978_v31 = vpop.f32.mrb[40].mxu0 }
 0xa94   :  { %v1466_v57 = vpop.f32.mrb[41].mxu0 }
 0xa95   :  { %v1475_v62 = vpack.c.bf16 %v2978_v31, %v1466_v57 }
 0xa97   :  { %3035 = vmatprep.subr.bf16.mxu0 %v1475_v62 }
 0xa98   :  { %3036 = vmatpush3.bf16.msra.mxu0 %v1475_v62 }
 0xa99   :  { %3442 = vmatprep.subr.bf16.mxu0 %v3441_v56 }
 0xa9b   :  { %3038 = vmatmul.mubr.msk.bf16.vlgmr.msra.gmra.mrb[44].mxu0 %vm467_vm2, %v3886_v42  ;;  %v4379_v42 = vpop.f32.mrb[45].mxu1 }
 0xa9c   :  { %3041 = vmatprep.mubr.msk.bf16.mxu0 %vm467_vm2, %v3888_v43  ;;  %v4381_v43 = vpop.f32.mrb[46].mxu1  ;;  %3444 = vmatpush3.bf16.msra.mxu0 %v3441_v56 }
 0xa9d   :  { %v4383_v41 = vpop.f32.mrb[47].mxu1  ;;  %3446 = vmatprep.subr.bf16.mxu0 %v3445_v35 }
 0xaa0   :  { %3448 = vmatpush3.bf16.msra.mxu0 %v3445_v35 }
 0xaa1   :  { %3450 = vmatprep.subr.bf16.mxu0 %v3449_v19 }
 0xaa3   :  { %3042 = vmatmul.mubr.msk.bf16.gmra.mrb[48].mxu0 %vm467_vm2, %v3902_v50  ;;  %v4385_v50 = vpop.f32.mrb[48].mxu1 }
 0xaa4   :  { %3045 = vmatprep.mubr.msk.bf16.mxu0 %vm467_vm2, %v3904_v51  ;;  %v4387_v51 = vpop.f32.mrb[49].mxu1  ;;  %3452 = vmatpush3.bf16.msra.mxu0 %v3449_v19 }
 0xaa5   :  { %v4389_v32 = vpop.f32.mrb[50].mxu1  ;;  %3454 = vmatprep.subr.bf16.mxu0 %v3453_v7 }
 0xaa8   :  { %3456 = vmatpush3.bf16.msra.mxu0 %v3453_v7 }
 0xaa9   :  { %3458 = vmatprep.subr.bf16.mxu0 %v3457_v10 }
 0xaab   :  { %3046 = vmatmul.mubr.msk.bf16.gmra.mrb[52].mxu0 %vm467_vm2, %v3918_v60  ;;  %v4391_v60 = vpop.f32.mrb[51].mxu1 }
 0xaac   :  { %3049 = vmatprep.mubr.msk.bf16.mxu0 %vm467_vm2, %v3920_v61  ;;  %v4393_v61 = vpop.f32.mrb[52].mxu1  ;;  %3460 = vmatpush3.bf16.msra.mxu0 %v3457_v10 }
 0xaad   :  { %v4395_v14 = vpop.f32.mrb[53].mxu1  ;;  %3462 = vmatprep.subr.bf16.mxu0 %v3461_v11 }
 0xab0   :  { %3464 = vmatpush3.bf16.msra.mxu0 %v3461_v11 }
 0xab1   :  { %3466 = vmatprep.subr.bf16.mxu0 %v3465_v17 }
 0xab3   :  { %3050 = vmatmul.mubr.msk.bf16.gmra.mrb[56].mxu0 %vm467_vm2, %v3930_v0  ;;  %v4397_v0 = vpop.f32.mrb[54].mxu1 }
 0xab4   :  { %v4399_v44 = vpop.f32.mrb[55].mxu1  ;;  %3468 = vmatpush3.bf16.msra.mxu0 %v3465_v17 }
 0xb6e   :  { %v3039_v33 = vpop.f32.mrb[44].mxu0 }
 0xb6f   :  { %v1681_v55 = vadd.f32 %v3039_v33, %v4361_v39  ;;  %v1672_v29 = vpop.f32.mrb[45].mxu0 }
 0xb70   :  { %v1673_v23 = vadd.f32 %v1672_v29, %v4357_v63  ;;  %v3040_v24 = vpop.f32.mrb[46].mxu0 }
 0xb71   :  { %v1741_v54 = vadd.f32 %v4408_v18, %v1681_v55  ;;  %v1684_v25 = vadd.f32 %v3040_v24, %v4359_v26  ;;  %v1675_v8 = vpop.f32.mrb[47].mxu0 }
 0xb72   :  { %v1739_v48 = vadd.f32 %v4408_v18, %v1673_v23  ;;  %v1676_v36 = vadd.f32 %v4355_v53, %v1675_v8 }
 0xb73   :  { %v1742_v28 = vadd.f32 %v4408_v18, %v1684_v25  ;;  %v1757_v4 = vmax.f32 %v1741_v54, 0.0 }
 0xb74   :  { %v1740_v38 = vadd.f32 %v4408_v18, %v1676_v36  ;;  %v1755_v21 = vmax.f32 %v1739_v48, 0.0 }
 0xb75   :  { %v1758_v37 = vmax.f32 %v1742_v28, 0.0 }
 0xb76   :  { %v1756_v39 = vmax.f32 %v1740_v38, 0.0  ;;  %v3043_v31 = vpop.f32.mrb[48].mxu0 }
 0xb77   :  { %v1772_v63 = vpack.c.bf16 %v1758_v37, %v1757_v4  ;;  %v1697_v57 = vadd.f32 %v3043_v31, %v4383_v41  ;;  %v1688_v62 = vpop.f32.mrb[49].mxu0 }
 0xb78   :  { %v1771_v13 = vpack.c.bf16 %v1756_v39, %v1755_v21  ;;  %v1689_v26 = vadd.f32 %v1688_v62, %v4379_v42  ;;  %v3044_v30 = vpop.f32.mrb[50].mxu0 }
 0xb79   :  { %v1745_v45 = vadd.f32 %v4408_v18, %v1697_v57  ;;  %v1700_v53 = vadd.f32 %v3044_v30, %v4381_v43  ;;  %v1691_v56 = vpop.f32.mrb[51].mxu0 }
 0xb7a   :  { %v1743_v46 = vadd.f32 %v4408_v18, %v1689_v26  ;;  %v1692_v35 = vadd.f32 %v4377_v22, %v1691_v56  ;;  %3054 = vmatpush3.bf16.msra.mxu1 %v1771_v13  ;;  %v3562_v13 = vld [vmem:[%s4602_s4] sm:$0xff]  ;;  %v1840_v56 = vrot.slane %v4404_v20, %v4039_v1  ;;  %v3595_v1 = vmov 0.0|0.0  }
 0xb7b   :  { %v1746_v47 = vadd.f32 %v4408_v18, %v1700_v53  ;;  %3055 = vmatprep.subr.bf16.mxu1 %v3592_v3  ;;  %v1761_v34 = vmax.f32 %v1745_v45, 0.0 }
 0xb7c   :  { %v1744_v41 = vadd.f32 %v4408_v18, %v1692_v35  ;;  %v1759_v42 = vmax.f32 %v1743_v46, 0.0 }
 0xb7d   :  { %v1762_v19 = vmax.f32 %v1746_v47, 0.0 }
 0xb7e   :  { %v1760_v5 = vmax.f32 %v1744_v41, 0.0  ;;  %v3047_v6 = vpop.f32.mrb[52].mxu0  ;;  %3056 = vmatpush3.bf16.msra.mxu1 %v1772_v63 }
 0xb7f   :  { %v1774_v7 = vpack.c.bf16 %v1762_v19, %v1761_v34  ;;  %v1713_v43 = vadd.f32 %v3047_v6, %v4391_v60  ;;  %v1704_v52 = vpop.f32.mrb[53].mxu0  ;;  %3057 = vmatprep.subr.bf16.mxu1 %v3592_v3 }
 0xb80   :  { %v1773_v22 = vpack.c.bf16 %v1760_v5, %v1759_v42  ;;  %v1705_v9 = vadd.f32 %v1704_v52, %v4387_v51  ;;  %v3048_v10 = vpop.f32.mrb[54].mxu0 }
 0xb81   :  { %v1749_v49 = vadd.f32 %v4408_v18, %v1713_v43  ;;  %v1716_v2 = vadd.f32 %v3048_v10, %v4389_v32  ;;  %v1707_v11 = vpop.f32.mrb[55].mxu0  ;;  %v2028_v10 = vld [vmem:[%s4607_s9] sm:$0xff] }
 0xb82   :  { %v1747_v16 = vadd.f32 %v4408_v18, %v1705_v9  ;;  %v1708_v59 = vadd.f32 %v4385_v50, %v1707_v11  ;;  %3058 = vmatpush3.bf16.msra.mxu1 %v1773_v22  ;;  %v2031_v11 = vld [vmem:[%s4607_s9 + $0x18] sm:$0xff] }
 0xb83   :  { %v1750_v17 = vadd.f32 %v4408_v18, %v1716_v2  ;;  %3059 = vmatprep.subr.bf16.mxu1 %v3592_v3  ;;  %v1765_v33 = vmax.f32 %v1749_v49, 0.0  ;;  %v2029_v49 = vld [vmem:[%s4607_s9 + $0x8] sm:$0xff] }
 0xb84   :  { %v1748_v60 = vadd.f32 %v4408_v18, %v1708_v59  ;;  %v1763_v51 = vmax.f32 %v1747_v16, 0.0  ;;  %v3477_v2 = vpack.c.bf16 %v2029_v49, %v2028_v10  ;;  %v2032_v59 = vld [vmem:[%s4607_s9 + $0x20] sm:$0xff]  ;;  %v2317_v10 = vld [vmem:[%s4607_s9 + $0xe8] sm:$0xff] }
 0xb85   :  { %v1766_v55 = vmax.f32 %v1750_v17, 0.0  ;;  %v2033_v17 = vld [vmem:[%s4607_s9 + $0x28] sm:$0xff] }
 0xb86   :  { %v1764_v29 = vmax.f32 %v1748_v60, 0.0  ;;  %v3051_v23 = vpop.f32.mrb[56].mxu0  ;;  %3060 = vmatpush3.bf16.msra.mxu1 %v1774_v7  ;;  %v3483_v60 = vpack.c.bf16 %v2033_v17, %v2032_v59  ;;  %v2303_v17 = vld [vmem:[%s4608_s10] ss:$0 sm:$0xff] }
 0xb87   :  { %v1776_v24 = vpack.c.bf16 %v1766_v55, %v1765_v33  ;;  %v1729_v32 = vadd.f32 %v3051_v23, %v4399_v44  ;;  %v1720_v54 = vpop.f32.mrb[57].mxu0  ;;  %3061 = vmatprep.subr.bf16.mxu1 %v3592_v3  ;;  %v2034_v33 = vld [vmem:[%s4607_s9 + $0x30] sm:$0xff]  ;;  %v2035_v55 = vld [vmem:[%s4607_s9 + $0x38] sm:$0xff]  ;;  %v2037_v23 = vld [vmem:[%s4607_s9 + $0x48] sm:$0xff] }
 0xb88   :  { %v1775_v50 = vpack.c.bf16 %v1764_v29, %v1763_v51  ;;  %v1721_v25 = vadd.f32 %v1720_v54, %v4395_v14  ;;  %v3052_v8 = vpop.f32.mrb[58].mxu0  ;;  %v3486_v51 = vpack.c.bf16 %v2035_v55, %v2034_v33  ;;  %v2036_v29 = vld [vmem:[%s4607_s9 + $0x40] sm:$0xff]  ;;  %v2039_v54 = vld [vmem:[%s4607_s9 + $0x58] sm:$0xff] }
 0xb89   :  { %v1753_v48 = vadd.f32 %v4408_v18, %v1729_v32  ;;  %v1732_v36 = vadd.f32 %v3052_v8, %v4397_v0  ;;  %v1723_v28 = vpop.f32.mrb[59].mxu0  ;;  %v2038_v32 = vld [vmem:[%s4607_s9 + $0x50] sm:$0xff]  ;;  %v2041_v8 = vld [vmem:[%s4607_s9 + $0x68] sm:$0xff] }
 0xb8a   :  { %v1751_v38 = vadd.f32 %v4408_v18, %v1721_v25  ;;  %v1724_v4 = vadd.f32 %v4393_v61, %v1723_v28  ;;  %3062 = vmatpush3.bf16.msra.mxu1 %v1775_v50  ;;  %v1835_v61 = vld [vmem:[#allocation2 + $0x2f0] sm:$0xff]  ;;  %v3492_v50 = vpack.c.bf16 %v2039_v54, %v2038_v32  ;;  %v2040_v25 = vld [vmem:[%s4607_s9 + $0x60] sm:$0xff]  ;;  %v2043_v28 = vld [vmem:[%s4607_s9 + $0x78] sm:$0xff] }
 0xb8b   :  { %v1754_v37 = vadd.f32 %v4408_v18, %v1732_v36  ;;  %3063 = vmatprep.subr.bf16.mxu1 %v3592_v3  ;;  %v1769_v21 = vmax.f32 %v1753_v48, 0.0  ;;  %v3495_v48 = vpack.c.bf16 %v2041_v8, %v2040_v25  ;;  %v2042_v36 = vld [vmem:[%s4607_s9 + $0x70] sm:$0xff] }
 0xb8c   :  { %v1752_v44 = vadd.f32 %v4408_v18, %v1724_v4  ;;  %v1767_v14 = vmax.f32 %v1751_v38, 0.0  ;;  %v1836_v18 = vld [vmem:[#allocation2 + $0x2f8] sm:$0xff]  ;;  %v3498_v38 = vpack.c.bf16 %v2043_v28, %v2042_v36 }
 0xb8d   :  { %v1770_v39 = vmax.f32 %v1754_v37, 0.0  ;;  %v3469_v57 = vpack.c.bf16 %v1836_v18, %v1835_v61  ;;  %v1949_v18 = vrot.slane %v4404_v20, %v4127_v15  ;;  %v2305_v15 = vld [vmem:[%s4607_s9 + $0x88] sm:$0xff] }
 0xb8e   :  { %v1768_v31 = vmax.f32 %v1752_v44, 0.0  ;;  %3064 = vmatpush3.bf16.msra.mxu1 %v1776_v24  ;;  %v3489_v24 = vpack.c.bf16 %v2037_v23, %v2036_v29 }
 0xb8f   :  { %v1778_v63 = vpack.c.bf16 %v1770_v39, %v1769_v21  ;;  %3065 = vmatprep.subr.bf16.mxu1 %v3592_v3  ;;  %3470 = vmatprep.subr.bf16.mxu0 %v3469_v57 }
 0xb90   :  { %v1777_v0 = vpack.c.bf16 %v1768_v31, %v1767_v14  ;;  %3472 = vmatpush3.bf16.msra.mxu0 %v3469_v57  ;;  %v1943_v31 = vrot.slane %v4404_v20, %v4124_v12  ;;  %v2304_v12 = vld [vmem:[%s4607_s9 + $0x80] sm:$0xff]  ;;  %v2306_v20 = vld [vmem:[%s4607_s9 + $0x90] sm:$0xff] }
 0xb91   :  { %3473 = vmatprep.subr.bf16.mxu0 %v3595_v1 }
 0xb92   :  { %3066 = vmatpush3.bf16.msra.mxu1 %v1777_v0 }
 0xb93   :  { %3067 = vmatprep.subr.bf16.mxu1 %v3592_v3 }
 0xb96   :  { %3068 = vmatpush3.bf16.msra.mxu1 %v1778_v63 }
 0xb97   :  { %3476 = vmatprep.subr.bf16.mxu1 %v3595_v1 }
 0xb99   :  { %3070 = vmatmul.mubr.msk.bf16.vlgmr.msra.gmra.mrb[56].mxu1 %vm4018_vm5, %v3594_v58 }
 0xb9a   :  { %3147 = vmatprep.mubr.msk.f32.mxu1 %vm3593_vm1, %v3592_v3  ;;  %3478 = vmatpush3.bf16.msra.mxu1 %v3477_v2 }
 0xb9b   :  { %3479 = vmatprep.subr.bf16.mxu1 %v3595_v1 }
 0xc6c   :  { %v1813_v62 = vpop.f32.mrb[56].mxu1 }
 0xc6d   :  { %v1814_v26 = vadd.f32 %v3562_v13, %v1813_v62  ;;  %v3071_v30 = vpop.f32.mrb[57].mxu1 }
 0xc6e   :  { %v1816_v45 = vpop.f32.mrb[58].mxu1 }
 0xc6f   :  { %v1817_v58 = vadd.f32 %v3563_v40, %v1816_v45  ;;  %v3072_v53 = vpop.f32.mrb[59].mxu1  ;;  %3105 = vmatprep.mubr.f32.mxu0 %v1814_v26 }
 0xc70   :  { %v1954_v53 = vld [vmem:[%s4603_s5] sm:$0x3] }
 0xc71   :  { %3106 = vmatmul.mubr.f32.vlgmr.msra.gmra.mrb[42].mxu0 %v1817_v58 }
 0xc72   :  { %3112 = vmatprep.mubr.msk.f32.mxu0 %vm3593_vm1, %v3592_v3 }
 0xd44   :  { %v3107_v46 = vpop.f32.mrb[42].mxu0 }
 0xd45   :  { %v1913_v35 = vadd.f32 %v3107_v46, %v1840_v56  ;;  %v1907_v47 = vpop.f32.mrb[43].mxu0  ;;  %v2307_v46 = vld [vmem:[%s4607_s9 + $0x98] sm:$0xff] }
 0xd46   :  { %v1908_v41 = vadd.f32 %v1907_v47, %v1840_v56  ;;  %v3501_v56 = vpack.c.bf16 %v2305_v15, %v2304_v12  ;;  %v2309_v47 = vld [vmem:[%s4607_s9 + $0xa8] sm:$0xff] }
 0xd47   :  { %1918 = vadd.xlane.f32.xlu0 %v1913_v35 }
 0xd48   :  { %1916 = vadd.xlane.f32.xlu1 %v1908_v41 }
 0xdd4   :  { %v1919_v34 = vpop.xlane.xlu0 %1918 }
 0xdd5   :  { %v1921_v19 = vmul.f32 0.03125, %v1919_v34  ;;  %v1917_v42 = vpop.xlane.xlu1 %1916  ;;  %v2310_v34 = vld [vmem:[%s4607_s9 + $0xb0] sm:$0xff] }
 0xdd6   :  { %v1920_v5 = vmul.f32 0.03125, %v1917_v42 }
 0xdd7   :  { %v1923_v6 = vsub.f32 %v1913_v35, %v1921_v19  ;;  %v3504_v35 = vpack.c.bf16 %v2307_v46, %v2306_v20  ;;  %v2311_v19 = vld [vmem:[%s4607_s9 + $0xb8] sm:$0xff] }
 0xdd8   :  { %v1922_v7 = vsub.f32 %v1908_v41, %v1920_v5  ;;  %v3510_v42 = vpack.c.bf16 %v2311_v19, %v2310_v34  ;;  %v2312_v5 = vld [vmem:[%s4607_s9 + $0xc0] sm:$0xff] }
 0xdd9   :  { %v1925_v43 = vmul.f32 %v4045_v27, %v1923_v6  ;;  %v2313_v6 = vld [vmem:[%s4607_s9 + $0xc8] sm:$0xff] }
 0xdda   :  { %v1924_v52 = vmul.f32 %v4045_v27, %v1922_v7  ;;  %v2030_v27 = vld [vmem:[%s4607_s9 + $0x10] sm:$0xff]  ;;  %v3513_v7 = vpack.c.bf16 %v2313_v6, %v2312_v5 }
 0xddb   :  { %v1927_v22 = vmul.f32 %v1925_v43, %v1925_v43  ;;  %v3480_v16 = vpack.c.bf16 %v2031_v11, %v2030_v27  ;;  %v2318_v11 = vld [vmem:[%s4607_s9 + $0xf0] sm:$0xff] }
 0xddc   :  { %v1926_v9 = vmul.f32 %v1924_v52, %v1924_v52 }
 0xddd   :  { %1930 = vadd.xlane.f32.xlu0 %v1927_v22  ;;  %3481 = vmatpush3.bf16.msra.mxu1 %v3480_v16  ;;  %v2319_v16 = vld [vmem:[%s4607_s9 + $0xf8] sm:$0xff] }
 0xdde   :  { %1928 = vadd.xlane.f32.xlu1 %v1926_v9  ;;  %3482 = vmatprep.subr.bf16.mxu1 %v3595_v1  ;;  %v2316_v9 = vld [vmem:[%s4607_s9 + $0xe0] sm:$0xff]  ;;  %v3522_v59 = vpack.c.bf16 %v2319_v16, %v2318_v11 }
 0xddf   :  { %v3519_v49 = vpack.c.bf16 %v2317_v10, %v2316_v9 }
 0xde1   :  { %3484 = vmatpush3.bf16.msra.mxu1 %v3483_v60 }
 0xde2   :  { %3485 = vmatprep.subr.bf16.mxu1 %v3595_v1 }
 0xde5   :  { %3487 = vmatpush3.bf16.msra.mxu1 %v3486_v51  ;;  %v2320_v51 = vld [vmem:[%s4608_s10 + $0x1] ss:$0 sm:$0xff] }
 0xde6   :  { %3488 = vmatprep.subr.bf16.mxu1 %v3595_v1 }
 0xde9   :  { %3490 = vmatpush3.bf16.msra.mxu1 %v3489_v24 }
 0xdea   :  { %3491 = vmatprep.subr.bf16.mxu1 %v3595_v1 }
 0xded   :  { %3493 = vmatpush3.bf16.msra.mxu1 %v3492_v50 }
 0xdee   :  { %3494 = vmatprep.subr.bf16.mxu1 %v3595_v1 }
 0xdf1   :  { %3496 = vmatpush3.bf16.msra.mxu1 %v3495_v48 }
 0xdf2   :  { %3497 = vmatprep.subr.bf16.mxu1 %v3595_v1 }
 0xdf5   :  { %3499 = vmatpush3.bf16.msra.mxu1 %v3498_v38 }
 0xe6a   :  { %v1931_v4 = vpop.xlane.xlu0 %1930 }
 0xe6b   :  { %v1933_v37 = vmul.f32 0.03125, %v1931_v4  ;;  %v1929_v44 = vpop.xlane.xlu1 %1928 }
 0xe6c   :  { %v1932_v21 = vmul.f32 0.03125, %v1929_v44 }
 0xe6d   :  { %v1935_v39 = vadd.f32 1e-05, %v1933_v37 }
 0xe6e   :  { %v1934_v14 = vadd.f32 1e-05, %v1932_v21 }
 0xe6f   :  { %3542 = vrsqrt.f32 %v1935_v39 }
 0xe70   :  { %3544 = vrsqrt.f32 %v1934_v14 }
 0xe79   :  { %v3543_v63 = vpop.eup %3542 }
 0xe7a   :  { %v3545_v0 = vpop.eup %3544  ;;  %v1939_v61 = vmul.f32 %v3543_v63, %v1925_v43  ;;  %v2314_v43 = vld [vmem:[%s4607_s9 + $0xd0] sm:$0xff] }
 0xe7b   :  { %v1938_v57 = vmul.f32 %v3545_v0, %v1924_v52  ;;  %v2315_v52 = vld [vmem:[%s4607_s9 + $0xd8] sm:$0xff] }
 0xe7c   :  { %v1945_v62 = vmul.f32 %v1943_v31, %v1939_v61  ;;  %v3516_v22 = vpack.c.bf16 %v2315_v52, %v2314_v43 }
 0xe7d   :  { %v1944_v13 = vmul.f32 %v1943_v31, %v1938_v57 }
 0xe7e   :  { %v1951_v26 = vadd.f32 %v1949_v18, %v1945_v62 }
 0xe7f   :  { %v1950_v30 = vadd.f32 %v1949_v18, %v1944_v13 }
 0xe80   :  { %v1953_v45 = vmax.f32 %v1951_v26, 0.0 }
 0xe81   :  { %v1952_v40 = vmax.f32 %v1950_v30, 0.0 }
 0xe83   :  { %v3474_v58 = vpack.c.bf16 %v1953_v45, %v1952_v40 }
 0xe85   :  { %3475 = vmatpush3.bf16.msra.mxu0 %v3474_v58 }
 0xe86   :  { %3500 = vmatprep.subr.bf16.mxu0 %v3595_v1 }
 0xe88   :  { %3113 = vmatmul.mubr.msk.f32.vlgmr.msra.gmra.mrb[60].mxu0 %vm467_vm2, %v1954_v53 }
 0xe89   :  { %3182 = vmatprep.mubr.msk.f32.mxu0 %vm3593_vm1, %v3592_v3  ;;  %3502 = vmatpush3.bf16.msra.mxu0 %v3501_v56  ;;  %v2308_v3 = vld [vmem:[%s4607_s9 + $0xa0] sm:$0xff] }
 0xe8a   :  { %3503 = vmatprep.subr.bf16.mxu0 %v3595_v1  ;;  %v3507_v41 = vpack.c.bf16 %v2309_v47, %v2308_v3 }
 0xe8d   :  { %3505 = vmatpush3.bf16.msra.mxu0 %v3504_v35 }
 0xe8e   :  { %3506 = vmatprep.subr.bf16.mxu0 %v3595_v1 }
 0xe91   :  { %3508 = vmatpush3.bf16.msra.mxu0 %v3507_v41 }
 0xe92   :  { %3509 = vmatprep.subr.bf16.mxu0 %v3595_v1 }
 0xe95   :  { %3511 = vmatpush3.bf16.msra.mxu0 %v3510_v42 }
 0xe96   :  { %3512 = vmatprep.subr.bf16.mxu0 %v3595_v1 }
 0xe99   :  { %3514 = vmatpush3.bf16.msra.mxu0 %v3513_v7 }
 0xe9a   :  { %3515 = vmatprep.subr.bf16.mxu0 %v3595_v1 }
 0xe9d   :  { %3517 = vmatpush3.bf16.msra.mxu0 %v3516_v22 }
 0xe9e   :  { %3518 = vmatprep.subr.bf16.mxu0 %v3595_v1 }
 0xea1   :  { %3520 = vmatpush3.bf16.msra.mxu0 %v3519_v49 }
 0xea2   :  { %3521 = vmatprep.subr.bf16.mxu0 %v3595_v1 }
 0xea5   :  { %3523 = vmatpush3.bf16.msra.mxu0 %v3522_v59 }
 0xf5b   :  { %v2024_v27 = vpop.f32.mrb[60].mxu0 }
 0xf5c   :  { %v3114_v2 = vpop.f32.mrb[61].mxu0  ;;  %3148 = vmatmul.mubr.f32.vlgmr.msra.gmra.mrb[60].mxu1 %v2024_v27 }
0x102f   :  { %v2115_v60 = vpop.f32.mrb[60].mxu1 }
0x1030   :  { %v2116_v33 = vadd.f32 %v2303_v17, %v2115_v60  ;;  %v3149_v1 = vpop.f32.mrb[61].mxu1 }
0x1032   :  { %v2119_v55 = vmax.f32 %v2116_v33, 0.0 }
0x1034   :  { %3183 = vmatmul.mubr.f32.vlgmr.msra.gmra.mrb[62].mxu0 %v2119_v55 }
0x1107   :  { %v2208_v29 = vpop.f32.mrb[62].mxu0 }
0x1108   :  { %v2209_v23 = vadd.f32 %v2320_v51, %v2208_v29  ;;  %v3184_v24 = vpop.f32.mrb[63].mxu0 }
0x110a   :  { %2212 = vst [vmem:[%s4609_s11] sm:$0x3] %v2209_v23 }
0x110b   :  { %2217 = vsyncpa [#allocation3], 1 }

</bundles_post_ra>
